<compile_context>
chip_gen: v7x
topology: tpu7x:2x2x1
jax: 0.10.0
libtpu: 0.0.40
codegen_flags: <defaults>
</compile_context>

<pallas_src>
import functools

import numpy as np
import jax
import jax.numpy as jnp
from jax.experimental import pallas as pl
from jax.experimental.pallas import tpu as pltpu


# -----------------------------------------------------------------------------
# Haar-DWT (level 1) + bilinear-upsample operators (host-side, analytic, cached)
# -----------------------------------------------------------------------------
def _dwt_matrices(n):
    """Haar analysis matrices (n//2, n): lo = (x0+x1)/sqrt(2), hi = (x0-x1)/sqrt(2)."""
    s = 1.0 / np.sqrt(2.0)
    half = n // 2
    d_lo = np.zeros((half, n), np.float32)
    d_hi = np.zeros((half, n), np.float32)
    idx = np.arange(half)
    d_lo[idx, 2 * idx] = s
    d_lo[idx, 2 * idx + 1] = s
    d_hi[idx, 2 * idx] = s
    d_hi[idx, 2 * idx + 1] = -s
    return d_lo, d_hi


def _bilinear_upsample_matrix(n_out, n_in):
    """torch.nn.functional.interpolate(mode='bilinear', align_corners=False)."""
    U = np.zeros((n_out, n_in), np.float32)
    scale = n_in / n_out
    for r in range(n_out):
        src = (r + 0.5) * scale - 0.5
        src = max(src, 0.0)  # torch clamps negative source index
        i0 = int(np.floor(src))
        frac = src - i0
        i0c = min(max(i0, 0), n_in - 1)
        i1c = min(i0 + 1, n_in - 1)
        U[r, i0c] += 1.0 - frac
        U[r, i1c] += frac
    return U


@functools.lru_cache(maxsize=None)
def _wavelet_operators(C, H, W):
    """Cached analytic operators (bf16 device arrays), keyed on (C, H, W).

    L    : (2*C*H, C*H) = [kron(I_C, Alo); kron(I_C, Ahi)]   (sub-band major, channel minor)
    BloT : (W, W)  lowpass  column operator (upsampled)
    BhiT : (W, W)  highpass column operator (upsampled)

    Subbands (cH, cV, cD):  cH = Ahi X Blo^T,  cV = Alo X Bhi^T,  cD = Ahi X Bhi^T
    """
    dlo_h, dhi_h = _dwt_matrices(H)
    dlo_w, dhi_w = _dwt_matrices(W)
    U_h = _bilinear_upsample_matrix(H, H // 2)
    U_w = _bilinear_upsample_matrix(W, W // 2)
    Alo, Ahi = U_h @ dlo_h, U_h @ dhi_h          # (H, H)
    Blo, Bhi = U_w @ dlo_w, U_w @ dhi_w          # (W, W)
    eye_c = np.eye(C, dtype=np.float32)
    L = np.concatenate([np.kron(eye_c, Alo), np.kron(eye_c, Ahi)], axis=0)  # (2CH, CH)
    return (jnp.asarray(L, jnp.bfloat16),
            jnp.asarray(Blo.T, jnp.bfloat16),
            jnp.asarray(Bhi.T, jnp.bfloat16))


def _round_up(v, m):
    return ((v + m - 1) // m) * m


# -----------------------------------------------------------------------------
# Fused Pallas kernel: wavelet subbands + upsample + concat + 4x4 patchify
#                      + layer-0 linear + bias + LeakyReLU
# -----------------------------------------------------------------------------
def _freq_layer0_kernel(x_ref, l_ref, blot_ref, bhit_ref, w0_ref, b0_ref, o_ref,
                        *, C, H, W, PP, D0, slope):
    # x_ref    : (1, C*H, W) f32   channels stacked along rows (free reshape of NCHW)
    # l_ref    : (2*C*H, C*H) bf16 block-diag [lowpass; highpass] row operator
    # blot_ref : (W, W) bf16       lowpass  column operator
    # bhit_ref : (W, W) bf16       highpass column operator
    # w0_ref   : (4*C*PP*PP, D0) bf16  layer-0 weight, rows ordered (dx, c_out, dy)
    # b0_ref   : (1, D0) f32
    # o_ref    : (1, (H//PP)*(W//PP), D0) bf16  -> layer-0 activations (lane-dense)
    CH = C * H
    Hp, Wp = H // PP, W // PP
    F = 4 * C * PP                                   # features per dx block = (c_out, dy)

    x = x_ref[0]                                     # (CH, W) f32
    xb = x.astype(jnp.bfloat16)

    # One block-diagonal left matmul produces lo & hi row transforms for all channels.
    z = jnp.dot(l_ref[...], xb, preferred_element_type=jnp.float32)       # (2CH, W)
    zb = z.astype(jnp.bfloat16)

    # Two lane-aligned (W, W) right matmuls (no misaligned lane slices).
    y_h = jnp.dot(zb[CH:, :], blot_ref[...], preferred_element_type=jnp.float32)   # cH  (CH, W)
    y_vd = jnp.dot(zb, bhit_ref[...], preferred_element_type=jnp.float32)          # [cV; cD] (2CH, W)

    # Full 4C-channel stack in PyTorch channel order [x_c, cH_c, cV_c, cD_c].
    y_all = jnp.concatenate([x, y_h, y_vd], axis=0)                       # (4C*H, W) f32

    # In-VMEM PPxPP patchify: rows (c_out, ph, dy) x cols (pw, dx)
    #   -> per-dx matrices with rows (ph, pw) and cols (c_out, dy).
    r = y_all.reshape(4 * C, Hp, PP, W)              # (c_out, ph, dy, W)     free
    r = jnp.transpose(r, (1, 0, 2, 3))               # (ph, c_out, dy, W)     row moves only
    r = r.reshape(Hp, 4 * C * PP, W)                 # (ph, (c_out,dy), W)    free
    r = jnp.swapaxes(r, 1, 2)                        # (ph, W, (c_out,dy))    the one real transpose
    r = r.reshape(Hp, Wp, PP, F)                     # (ph, pw, dx, (c_out,dy)) free

    # Fused layer-0: h0 = leaky_relu(patch @ w0 + b0); accumulate over the 4 dx blocks
    # (K = 48 per block, 192 total); bf16 operands, f32 accumulation.
    acc = None
    for dx in range(PP):
        lhs = r[:, :, dx, :].reshape(Hp * Wp, F).astype(jnp.bfloat16)     # (Hp*Wp, F)
        part = jnp.dot(lhs, w0_ref[dx * F:(dx + 1) * F, :],
                       preferred_element_type=jnp.float32)                # (Hp*Wp, D0)
        acc = part if acc is None else acc + part
    acc = acc + b0_ref[...].astype(jnp.float32)
    acc = jnp.where(acc >= 0.0, acc, slope * acc)
    o_ref[0] = acc.astype(o_ref.dtype)               # (Hp*Wp, D0) single lane-dense store


def freq_layer0(x, w0, b0, *, patch=4, slope=0.2):
    """x: (B, C, H, W) f32 -> (B, (H/patch)*(W/patch), D0) bf16 layer-0 activations."""
    B, C, H, W = x.shape
    assert H % 2 == 0 and W % 2 == 0 and H % patch == 0 and W % patch == 0
    Hp, Wp = H // patch, W // patch
    D0 = w0.shape[1]
    L, BloT, BhiT = _wavelet_operators(C, H, W)
    xr = x.reshape(B, C * H, W)                      # free (contiguous) reshape of NCHW
    return pl.pallas_call(
        functools.partial(_freq_layer0_kernel, C=C, H=H, W=W, PP=patch, D0=D0, slope=slope),
        out_shape=jax.ShapeDtypeStruct((B, Hp * Wp, D0), jnp.bfloat16),
        grid=(B,),                                    # >= 2 parallel steps -> both v7x TCs busy
        in_specs=[
            pl.BlockSpec((1, C * H, W), lambda b: (b, 0, 0)),
            pl.BlockSpec((2 * C * H, C * H), lambda b: (0, 0)),   # operators resident
            pl.BlockSpec((W, W), lambda b: (0, 0)),
            pl.BlockSpec((W, W), lambda b: (0, 0)),
            pl.BlockSpec((4 * C * patch * patch, D0), lambda b: (0, 0)),  # layer-0 weight resident
            pl.BlockSpec((1, D0), lambda b: (0, 0)),
        ],
        out_specs=pl.BlockSpec((1, Hp * Wp, D0), lambda b: (b, 0, 0)),
        compiler_params=pltpu.CompilerParams(dimension_semantics=("parallel",)),
    )(xr, L, BloT, BhiT, w0, b0.reshape(1, D0))


# -----------------------------------------------------------------------------
# Pallas kernel: fused matmul + bias + LeakyReLU (bf16 in / bf16 out, f32 accum)
# -----------------------------------------------------------------------------
def _linear_kernel(x_ref, w_ref, b_ref, o_ref, *, slope):
    y = jnp.dot(x_ref[...], w_ref[...], preferred_element_type=jnp.float32)
    y = y + b_ref[...].astype(jnp.float32)
    if slope is not None:
        y = jnp.where(y >= 0.0, y, slope * y)
    o_ref[...] = y.astype(o_ref.dtype)


def pallas_linear(x, w, b, slope=None, num_tiles=2):
    """y = leaky_relu(x @ w + b).  x/w already bf16 (no per-tile casts); w/b resident.

    Rows are split into `num_tiles` "parallel" tiles so v7x's two TensorCores both get
    work; on single-TC v5e/v6e the extra grid step costs ~0.35us (noise at these sizes).
    """
    M, K = x.shape
    K2, N = w.shape
    assert K == K2
    tm = M if M <= 8 else min(M, _round_up(pl.cdiv(M, num_tiles), 8))
    grid_m = pl.cdiv(M, tm)
    return pl.pallas_call(
        functools.partial(_linear_kernel, slope=slope),
        out_shape=jax.ShapeDtypeStruct((M, N), jnp.bfloat16),
        grid=(grid_m,),
        in_specs=[
            pl.BlockSpec((tm, K), lambda i: (i, 0)),
            pl.BlockSpec((K, N), lambda i: (0, 0)),
            pl.BlockSpec((1, N), lambda i: (0, 0)),
        ],
        out_specs=pl.BlockSpec((tm, N), lambda i: (i, 0)),
        compiler_params=pltpu.CompilerParams(dimension_semantics=("parallel",)),
    )(x, w, b.reshape(1, N))


# -----------------------------------------------------------------------------
# Minimal core discriminator (stand-in for R3GANDiscriminator)
# -----------------------------------------------------------------------------
def init_core_params(C, H, W, d0=128, d1=128, patch0=4, key=None):
    # TODO(synk): R3GANDiscriminator source was not provided; this is a minimal
    # patchify-conv discriminator with the same (score, features) interface.
    if key is None:
        key = jax.random.PRNGKey(42)
    k0, k1, k2 = jax.random.split(key, 3)
    h1, w1 = H // patch0 // 2, W // patch0 // 2
    return {
        # layer-0 weight rows ordered (dx, c_out, dy) to match the fused kernel's layout.
        "w0": (jax.random.normal(k0, (4 * C * patch0 * patch0, d0), jnp.float32) * 0.05
               ).astype(jnp.bfloat16),
        "b0": jnp.zeros((d0,), jnp.float32),
        "w1": (jax.random.normal(k1, (d0 * 4, d1), jnp.float32) * 0.05).astype(jnp.bfloat16),
        "b1": jnp.zeros((d1,), jnp.float32),
        "w2": jax.random.normal(k2, (d1 * h1 * w1, 1), jnp.float32) * 0.02,
        "b2": jnp.zeros((1,), jnp.float32),
    }


def freq_discriminator(x, params, *, patch0=4, slope=0.2):
    """x: (B, C, H, W) f32 NCHW -> (score (B,), [hidden features in NCHW])."""
    B, C, H, W = x.shape
    d0 = params["w0"].shape[1]
    d1 = params["w1"].shape[1]
    H0, W0 = H // patch0, W // patch0

    # Fused: Haar subbands + bilinear upsample + channel concat + 4x4 patchify
    # + layer-0 linear + LeakyReLU, all in one kernel (no NCHW intermediate in HBM).
    h0 = freq_layer0(x, params["w0"], params["b0"], patch=patch0, slope=slope)  # (B, H0*W0, d0) bf16
    h0_map = h0.reshape(B, H0, W0, d0)                                          # NHWC, free reshape

    # layer 1: channels-last 2x2 patchify (minor dim untouched -> cheap relayout) + fused linear.
    p1 = h0_map.reshape(B, H0 // 2, 2, W0 // 2, 2, d0)
    p1 = p1.transpose(0, 1, 3, 2, 4, 5).reshape(B * (H0 // 2) * (W0 // 2), 4 * d0)
    h1 = pallas_linear(p1, params["w1"], params["b1"], slope=slope)
    h1_map = h1.reshape(B, H0 // 2, W0 // 2, d1)

    # Final scorer: (B, K) @ (K, 1); an N=1 Pallas block lane-pads to 128, keep it in XLA.
    flat = h1_map.reshape(B, -1).astype(jnp.float32)
    score = jnp.dot(flat, params["w2"]) + params["b2"]                          # (B, 1)

    # Convert features to NCHW only at the API boundary (PyTorch layout).
    feats = [jnp.transpose(h0_map.astype(jnp.float32), (0, 3, 1, 2)),
             jnp.transpose(h1_map.astype(jnp.float32), (0, 3, 1, 2))]
    return score[:, 0], feats


# -----------------------------------------------------------------------------
# Plain-JAX references (for correctness checks only)
# -----------------------------------------------------------------------------
def _wavelet_concat_ref(x):
    """WaveletDecomp(J=1,'haar') + bilinear upsample + concat, f32, no Pallas."""
    _, _, H, W = x.shape
    dlo_h, dhi_h = _dwt_matrices(H)
    dlo_w, dhi_w = _dwt_matrices(W)
    U_h = _bilinear_upsample_matrix(H, H // 2)
    U_w = _bilinear_upsample_matrix(W, W // 2)
    A = [U_h @ dhi_h, U_h @ dlo_h, U_h @ dhi_h]                  # cH, cV, cD row ops
    Bt = [(U_w @ dlo_w).T, (U_w @ dhi_w).T, (U_w @ dhi_w).T]     # cH, cV, cD col ops
    subs = [jnp.einsum('ij,bcjw,wk->bcik', jnp.asarray(A[k]), x, jnp.asarray(Bt[k]))
            for k in range(3)]
    return jnp.concatenate([x] + subs, axis=1)                   # (B, 4C, H, W)


def _layer0_ref(x, w0, b0, patch=4, slope=0.2):
    """f32 reference for the fused wavelet + patchify + layer-0 kernel."""
    wav = _wavelet_concat_ref(x)                                 # (B, 4C, H, W)
    B, C4, H, W = wav.shape
    Hp, Wp = H // patch, W // patch
    t = wav.reshape(B, C4, Hp, patch, Wp, patch)                 # (b, c, ph, dy, pw, dx)
    t = t.transpose(0, 2, 4, 5, 1, 3)                            # (b, ph, pw, dx, c, dy)
    pat = t.reshape(B, Hp * Wp, patch * C4 * patch)              # feature order (dx, c, dy)
    y = jnp.einsum('bpf,fd->bpd', pat, w0.astype(jnp.float32)) + b0
    return jnp.where(y >= 0.0, y, slope * y)


# -----------------------------------------------------------------------------
if __name__ == "__main__":
    B, C, H, W = 2, 3, 32, 32            # C=3 -> concatenated channels = 12 (as in the config)
    key = jax.random.PRNGKey(0)
    x = jax.random.normal(key, (B, C, H, W), jnp.float32)

    params = init_core_params(C, H, W, d0=128, d1=128, patch0=4)

    # Correctness: fused wavelet + upsample + concat + patchify + layer-0 kernel vs plain JAX.
    h0 = freq_layer0(x, params["w0"], params["b0"], patch=4, slope=0.2)
    jax.block_until_ready(h0)
    ref = _layer0_ref(x, params["w0"], params["b0"], patch=4, slope=0.2)
    np.testing.assert_allclose(np.asarray(h0.astype(jnp.float32)), np.asarray(ref),
                               atol=4e-2, rtol=4e-2)             # bf16 MXU operands

    score, features = freq_discriminator(x, params)
    jax.block_until_ready(score)
    for f in features:
        jax.block_until_ready(f)

    assert score.shape == (B,)
    assert features[0].shape == (B, 128, H // 4, W // 4)
    assert features[1].shape == (B, 128, H // 8, W // 8)
    print("KERNEL_OK")
</pallas_src>

<mosaic_0001>
module attributes {stable_mosaic.version = 11 : i64} {
  func.func @_freq_layer0_kernel(%arg0: i32, %arg1: memref<1x96x32xf32, #tpu.memory_space<vmem>>, %arg2: memref<192x96xbf16, #tpu.memory_space<vmem>>, %arg3: memref<32x32xbf16, #tpu.memory_space<vmem>>, %arg4: memref<32x32xbf16, #tpu.memory_space<vmem>>, %arg5: memref<192x128xbf16, #tpu.memory_space<vmem>>, %arg6: memref<1x128xf32, #tpu.memory_space<vmem>>, %arg7: memref<1x64x128xbf16, #tpu.memory_space<vmem>>) attributes {dimension_semantics = [#tpu.dimension_semantics<parallel>], iteration_bounds = array<i64: 2>, scalar_prefetch = 0 : i64, scratch_operands = 0 : i64, tpu.core_type = #tpu.core_type<tc>, window_params = [{transform_indices = @transform_0, window_bounds = array<i64: 1, 96, 32>}, {pipeline_mode = #tpu.pipeline_mode<synchronous>, transform_indices = @transform_1, window_bounds = array<i64: 192, 96>}, {pipeline_mode = #tpu.pipeline_mode<synchronous>, transform_indices = @transform_2, window_bounds = array<i64: 32, 32>}, {pipeline_mode = #tpu.pipeline_mode<synchronous>, transform_indices = @transform_3, window_bounds = array<i64: 32, 32>}, {pipeline_mode = #tpu.pipeline_mode<synchronous>, transform_indices = @transform_4, window_bounds = array<i64: 192, 128>}, {pipeline_mode = #tpu.pipeline_mode<synchronous>, transform_indices = @transform_5, window_bounds = array<i64: 1, 128>}, {transform_indices = @transform_6, window_bounds = array<i64: 1, 64, 128>}]} {
    %c0 = arith.constant 0 : index
    %c0_0 = arith.constant 0 : index
    %c0_1 = arith.constant 0 : index
    %0 = vector.load %arg1[%c0, %c0_0, %c0_1] : memref<1x96x32xf32, #tpu.memory_space<vmem>>, vector<1x96x32xf32>
    %1 = vector.shape_cast %0 : vector<1x96x32xf32> to vector<96x32xf32>
    %2 = arith.truncf %1 : vector<96x32xf32> to vector<96x32xbf16>
    %c0_2 = arith.constant 0 : index
    %c0_3 = arith.constant 0 : index
    %3 = vector.load %arg2[%c0_2, %c0_3] : memref<192x96xbf16, #tpu.memory_space<vmem>>, vector<192x96xbf16>
    %cst = arith.constant dense<0.000000e+00> : vector<192x32xf32>
    %4 = tpu.matmul %3, %2, %cst {dimension_numbers = #tpu.dot_dimension_numbers<[1], [0], [0], [1], [0, 0, 1, 1], [], []>} : vector<192x96xbf16>, vector<96x32xbf16>, vector<192x32xf32> -> vector<192x32xf32>
    %5 = arith.truncf %4 : vector<192x32xf32> to vector<192x32xbf16>
    %6 = vector.extract_strided_slice %5 {offsets = [96, 0], sizes = [96, 32], strides = [1, 1]} : vector<192x32xbf16> to vector<96x32xbf16>
    %c0_4 = arith.constant 0 : index
    %c0_5 = arith.constant 0 : index
    %7 = vector.load %arg3[%c0_4, %c0_5] : memref<32x32xbf16, #tpu.memory_space<vmem>>, vector<32x32xbf16>
    %cst_6 = arith.constant dense<0.000000e+00> : vector<96x32xf32>
    %8 = tpu.matmul %6, %7, %cst_6 {dimension_numbers = #tpu.dot_dimension_numbers<[1], [0], [0], [1], [0, 0, 1, 1], [], []>} : vector<96x32xbf16>, vector<32x32xbf16>, vector<96x32xf32> -> vector<96x32xf32>
    %c0_7 = arith.constant 0 : index
    %c0_8 = arith.constant 0 : index
    %9 = vector.load %arg4[%c0_7, %c0_8] : memref<32x32xbf16, #tpu.memory_space<vmem>>, vector<32x32xbf16>
    %cst_9 = arith.constant dense<0.000000e+00> : vector<192x32xf32>
    %10 = tpu.matmul %5, %9, %cst_9 {dimension_numbers = #tpu.dot_dimension_numbers<[1], [0], [0], [1], [0, 0, 1, 1], [], []>} : vector<192x32xbf16>, vector<32x32xbf16>, vector<192x32xf32> -> vector<192x32xf32>
    %11 = tpu.concatenate %1, %8, %10 in 0 : vector<96x32xf32>, vector<96x32xf32>, vector<192x32xf32> -> vector<384x32xf32>
    %12 = vector.shape_cast %11 : vector<384x32xf32> to vector<12x8x4x32xf32>
    %13 = tpu.transpose %12, [1, 0, 2, 3] : vector<12x8x4x32xf32> -> vector<8x12x4x32xf32>
    %14 = vector.shape_cast %13 : vector<8x12x4x32xf32> to vector<8x48x32xf32>
    %15 = tpu.transpose %14, [0, 2, 1] : vector<8x48x32xf32> -> vector<8x32x48xf32>
    %16 = vector.shape_cast %15 : vector<8x32x48xf32> to vector<8x8x4x48xf32>
    %17 = vector.extract_strided_slice %16 {offsets = [0, 0, 0, 0], sizes = [8, 8, 1, 48], strides = [1, 1, 1, 1]} : vector<8x8x4x48xf32> to vector<8x8x1x48xf32>
    %18 = vector.shape_cast %17 : vector<8x8x1x48xf32> to vector<8x8x48xf32>
    %19 = vector.shape_cast %18 : vector<8x8x48xf32> to vector<64x48xf32>
    %20 = arith.truncf %19 : vector<64x48xf32> to vector<64x48xbf16>
    %c0_10 = arith.constant 0 : index
    %c0_11 = arith.constant 0 : index
    %21 = vector.load %arg5[%c0_10, %c0_11] : memref<192x128xbf16, #tpu.memory_space<vmem>>, vector<48x128xbf16>
    %cst_12 = arith.constant dense<0.000000e+00> : vector<64x128xf32>
    %22 = tpu.matmul %20, %21, %cst_12 {dimension_numbers = #tpu.dot_dimension_numbers<[1], [0], [0], [1], [0, 0, 1, 1], [], []>} : vector<64x48xbf16>, vector<48x128xbf16>, vector<64x128xf32> -> vector<64x128xf32>
    %23 = vector.extract_strided_slice %16 {offsets = [0, 0, 1, 0], sizes = [8, 8, 1, 48], strides = [1, 1, 1, 1]} : vector<8x8x4x48xf32> to vector<8x8x1x48xf32>
    %24 = vector.shape_cast %23 : vector<8x8x1x48xf32> to vector<8x8x48xf32>
    %25 = vector.shape_cast %24 : vector<8x8x48xf32> to vector<64x48xf32>
    %26 = arith.truncf %25 : vector<64x48xf32> to vector<64x48xbf16>
    %c48 = arith.constant 48 : index
    %c0_13 = arith.constant 0 : index
    %27 = vector.load %arg5[%c48, %c0_13] : memref<192x128xbf16, #tpu.memory_space<vmem>>, vector<48x128xbf16>
    %cst_14 = arith.constant dense<0.000000e+00> : vector<64x128xf32>
    %28 = tpu.matmul %26, %27, %cst_14 {dimension_numbers = #tpu.dot_dimension_numbers<[1], [0], [0], [1], [0, 0, 1, 1], [], []>} : vector<64x48xbf16>, vector<48x128xbf16>, vector<64x128xf32> -> vector<64x128xf32>
    %29 = arith.addf %22, %28 : vector<64x128xf32>
    %30 = vector.extract_strided_slice %16 {offsets = [0, 0, 2, 0], sizes = [8, 8, 1, 48], strides = [1, 1, 1, 1]} : vector<8x8x4x48xf32> to vector<8x8x1x48xf32>
    %31 = vector.shape_cast %30 : vector<8x8x1x48xf32> to vector<8x8x48xf32>
    %32 = vector.shape_cast %31 : vector<8x8x48xf32> to vector<64x48xf32>
    %33 = arith.truncf %32 : vector<64x48xf32> to vector<64x48xbf16>
    %c96 = arith.constant 96 : index
    %c0_15 = arith.constant 0 : index
    %34 = vector.load %arg5[%c96, %c0_15] : memref<192x128xbf16, #tpu.memory_space<vmem>>, vector<48x128xbf16>
    %cst_16 = arith.constant dense<0.000000e+00> : vector<64x128xf32>
    %35 = tpu.matmul %33, %34, %cst_16 {dimension_numbers = #tpu.dot_dimension_numbers<[1], [0], [0], [1], [0, 0, 1, 1], [], []>} : vector<64x48xbf16>, vector<48x128xbf16>, vector<64x128xf32> -> vector<64x128xf32>
    %36 = arith.addf %29, %35 : vector<64x128xf32>
    %37 = vector.extract_strided_slice %16 {offsets = [0, 0, 3, 0], sizes = [8, 8, 1, 48], strides = [1, 1, 1, 1]} : vector<8x8x4x48xf32> to vector<8x8x1x48xf32>
    %38 = vector.shape_cast %37 : vector<8x8x1x48xf32> to vector<8x8x48xf32>
    %39 = vector.shape_cast %38 : vector<8x8x48xf32> to vector<64x48xf32>
    %40 = arith.truncf %39 : vector<64x48xf32> to vector<64x48xbf16>
    %c144 = arith.constant 144 : index
    %c0_17 = arith.constant 0 : index
    %41 = vector.load %arg5[%c144, %c0_17] : memref<192x128xbf16, #tpu.memory_space<vmem>>, vector<48x128xbf16>
    %cst_18 = arith.constant dense<0.000000e+00> : vector<64x128xf32>
    %42 = tpu.matmul %40, %41, %cst_18 {dimension_numbers = #tpu.dot_dimension_numbers<[1], [0], [0], [1], [0, 0, 1, 1], [], []>} : vector<64x48xbf16>, vector<48x128xbf16>, vector<64x128xf32> -> vector<64x128xf32>
    %43 = arith.addf %36, %42 : vector<64x128xf32>
    %c0_19 = arith.constant 0 : index
    %c0_20 = arith.constant 0 : index
    %44 = vector.load %arg6[%c0_19, %c0_20] : memref<1x128xf32, #tpu.memory_space<vmem>>, vector<1x128xf32>
    %45 = vector.broadcast %44 : vector<1x128xf32> to vector<64x128xf32>
    %46 = arith.addf %43, %45 : vector<64x128xf32>
    %cst_21 = arith.constant 0.000000e+00 : f32
    %47 = vector.broadcast %cst_21 : f32 to vector<64x128xf32>
    %48 = arith.cmpf oge, %46, %47 : vector<64x128xf32>
    %cst_22 = arith.constant 2.000000e-01 : f32
    %49 = vector.broadcast %cst_22 : f32 to vector<64x128xf32>
    %50 = arith.mulf %49, %46 : vector<64x128xf32>
    %51 = arith.select %48, %46, %50 : vector<64x128xi1>, vector<64x128xf32>
    %52 = arith.truncf %51 : vector<64x128xf32> to vector<64x128xbf16>
    %c0_23 = arith.constant 0 : index
    %c0_24 = arith.constant 0 : index
    %c0_25 = arith.constant 0 : index
    %53 = vector.load %arg7[%c0_23, %c0_24, %c0_25] : memref<1x64x128xbf16, #tpu.memory_space<vmem>>, vector<1x64x128xbf16>
    %54 = vector.shape_cast %53 : vector<1x64x128xbf16> to vector<64x128xbf16>
    %55 = vector.shape_cast %52 : vector<64x128xbf16> to vector<1x64x128xbf16>
    tpu.vector_store %arg7[%c0_23, %c0_24, %c0_25], %55 {strides = array<i32>} : memref<1x64x128xbf16, #tpu.memory_space<vmem>>, vector<1x64x128xbf16>,
    return
  }
  func.func @transform_0(%arg0: i32) -> (i32, i32, i32) {
    %c0_i32 = arith.constant 0 : i32
    %c0_i32_0 = arith.constant 0 : i32
    %c0_i32_1 = arith.constant 0 : i32
    return %arg0, %c0_i32, %c0_i32_0 : i32, i32, i32
  }
  func.func @transform_1(%arg0: i32) -> (i32, i32) {
    %c0_i32 = arith.constant 0 : i32
    %c0_i32_0 = arith.constant 0 : i32
    %c0_i32_1 = arith.constant 0 : i32
    return %c0_i32, %c0_i32_0 : i32, i32
  }
  func.func @transform_2(%arg0: i32) -> (i32, i32) {
    %c0_i32 = arith.constant 0 : i32
    %c0_i32_0 = arith.constant 0 : i32
    %c0_i32_1 = arith.constant 0 : i32
    return %c0_i32, %c0_i32_0 : i32, i32
  }
  func.func @transform_3(%arg0: i32) -> (i32, i32) {
    %c0_i32 = arith.constant 0 : i32
    %c0_i32_0 = arith.constant 0 : i32
    %c0_i32_1 = arith.constant 0 : i32
    return %c0_i32, %c0_i32_0 : i32, i32
  }
  func.func @transform_4(%arg0: i32) -> (i32, i32) {
    %c0_i32 = arith.constant 0 : i32
    %c0_i32_0 = arith.constant 0 : i32
    %c0_i32_1 = arith.constant 0 : i32
    return %c0_i32, %c0_i32_0 : i32, i32
  }
  func.func @transform_5(%arg0: i32) -> (i32, i32) {
    %c0_i32 = arith.constant 0 : i32
    %c0_i32_0 = arith.constant 0 : i32
    %c0_i32_1 = arith.constant 0 : i32
    return %c0_i32, %c0_i32_0 : i32, i32
  }
  func.func @transform_6(%arg0: i32) -> (i32, i32, i32) {
    %c0_i32 = arith.constant 0 : i32
    %c0_i32_0 = arith.constant 0 : i32
    %c0_i32_1 = arith.constant 0 : i32
    return %arg0, %c0_i32, %c0_i32_0 : i32, i32, i32
  }
}

</mosaic_0001>

<bundles_post_ra>
// kernel: tpu_custom_call.1
= control target key start
LH: loop header
LB: loop body
LE: loop exit
PB: predicated region body
PF: predicated region fallthrough
CT: control target
= control target key end

     0   :  { %11 = vsyncpa [#allocation3], 0  ;;  %s4380_s0 = inlined_call_operand.vmem [shape: f32[2,96,32], index: 0, kind: input, shape index: {}]   ;;  %s4381_s1 = inlined_call_operand.vmem [shape: bf16[192,96], index: 1, kind: input, shape index: {}]   ;;  %s4382_s2 = inlined_call_operand.vmem [shape: bf16[32,32], index: 2, kind: input, shape index: {}]   ;;  %s4383_s3 = inlined_call_operand.vmem [shape: bf16[32,32], index: 3, kind: input, shape index: {}]   ;;  %s4384_s4 = inlined_call_operand.vmem [shape: bf16[192,128], index: 4, kind: input, shape index: {}]   ;;  %s4385_s5 = inlined_call_operand.vmem [shape: f32[1,128], index: 5, kind: input, shape index: {}]   ;;  %s4386_s6 = inlined_call_operand.hbm [shape: bf16[2,64,128], index: 6, kind: output, shape index: {}]  }
   0x1   :  { %13 = vsyncpa [#allocation3 + $0x1], 0  ;;  %s3156_s21 = smov 0   ;;  %s3158_s22 = smov 0  }
   0x2   :  { %s3160_s23 = smov 0   ;;  %s3162_s24 = smov 0  }
   0x3 LB: > { %s3177_s25 = sadd.s32 4294967295, %s3116_s24   ;;  %s2593_s26 = sadd.s32 4294967294, %s3116_s24   ;;  %s3116_s24 = sphi %s3162_s24, %s4465_s24   ;;  %s3112_s23 = sphi %s3160_s23, %s4464_s23   ;;  %s3108_s22 = sphi %s3158_s22, %s4463_s22   ;;  %s3104_s21 = sphi %s3156_s21, %s4462_s21  }
   0x4   : > { %s3181_s27 = sadd.s32 1, %s3116_s24   ;;  %s157_s28 = sadd.s32 1, %s3112_s23 }
   0x5   : > { %s154_s29 = ssub.s32 %s3116_s24, %s3181_s27  ;;  %p167_p0 = scmp.ne.s32.totalorder %s3112_s23, %s3108_s22 }
   0x6   : > { %p155_p1 = scmp.eq.s32.totalorder %s154_s29, 0  ;;  %p168_p2 = scmp.eq.s32.totalorder %s3177_s25, 1 }
   0x7   : > { %p173_p3 = scmp.ne.s32.totalorder %s3108_s22, %s3104_s21  ;;  %p174_p4 = scmp.eq.s32.totalorder %s2593_s26, 1 }
   0x8   : > { %s3192_s30 = scalar_select %p155_p1, %s3112_s23, %s157_s28  }
   0x9   : > { %p3194_p5 = por %p168_p2, %p167_p0  ;;  %p3198_p6 = por %p174_p4, %p173_p3 }
   0xa   : > { %p2596_p7 = scmp.ge.s32.totalorder %s3116_s24, 1  ;;  %p215_p8 = scmp.lt.s32.totalorder %s3116_s24, 3 }
   0xc   : > { %p216_p9 = pnand %p2596_p7, %p215_p8 }
   0xe   : > { %219 = sbr.rel (%p216_p9) target bundleno = 1102 (0x44e), region = 44 }
  0x15   : > { %p245_p10 = scmp.lt.s32.totalorder %s3177_s25, 1  ;;  %v3026_v0 = vld [vmem:[%s4381_s1] sm:$0xff]   ;;  %vm353_vm0 = vcmask 785408   ;;  %v3027_v20 = vld [vmem:[%s4381_s1 + $0x8] sm:$0xff]   ;;  %v3028_v22 = vld [vmem:[%s4381_s1 + $0x10] sm:$0xff]   ;;  %vm547_vm1 = vcmask 261120  }
  0x16   : > { %2823 = vmatprep.mubr.msk.bf16.mxu0 %vm353_vm0, %v3026_v0  ;;  %v3034_v11 = vld [vmem:[%s4381_s1 + $0x40] sm:$0xff]   ;;  %v3035_v21 = vld [vmem:[%s4381_s1 + $0x48] sm:$0xff]   ;;  %v3036_v23 = vld [vmem:[%s4381_s1 + $0x50] sm:$0xff]   ;;  %vm1559_vm2 = vcmask 1041409   ;;  %vm1562_vm3 = vcmask 1042434   ;;  %vm1565_vm4 = vcmask 1043459  }
  0x17   : > { %s246_s11 = scalar_select %p245_p10, %s3177_s25, 1  ;;  %2839 = vmatprep.mubr.msk.bf16.mxu1 %vm353_vm0, %v3034_v11  ;;  %v3029_v24 = vld [vmem:[%s4381_s1 + $0x18] sm:$0xff]   ;;  %v3030_v26 = vld [vmem:[%s4381_s1 + $0x20] sm:$0xff]   ;;  %v3031_v27 = vld [vmem:[%s4381_s1 + $0x28] sm:$0xff]   ;;  %vm1568_vm5 = vcmask 1044484   ;;  %vm1571_vm6 = vcmask 1045509  }
  0x18   : > { %v3037_v25 = vld [vmem:[%s4381_s1 + $0x58] sm:$0xff]   ;;  %v3032_v28 = vld [vmem:[%s4381_s1 + $0x30] sm:$0xff]   ;;  %v3038_v30 = vld [vmem:[%s4382_s2] sm:$0xff]   ;;  %vm1574_vm7 = vcmask 1046534   ;;  %vm1577_vm8 = vcmask 1047559   ;;  %vm1699_vm9 = vcmask 392192  }
  0x19   : > { %s2983_s12 = smul.u32 96, %s246_s11  ;;  %v3033_v29 = vld [vmem:[%s4381_s1 + $0x38] sm:$0xff]   ;;  %v3039_v31 = vld [vmem:[%s4382_s2 + $0x8] sm:$0xff]   ;;  %v3040_v32 = vld [vmem:[%s4383_s3] sm:$0xff]   ;;  %s3118_s26 = smov [#allocation2]  }
  0x1a   : > { %s3058_s28 = sshll.u32 %s3118_s26, 4  ;;  %s3059_s28 = int_to_ptr.vmem [resolvable:$false] %s3058_s28 }
  0x1b   : > { %s249_s15 = scalar_lea.vmem %s4380_s0, %s2983_s12  ;;  %s242_s12 = sand.u32 1, %s3108_s22  }
  0x1c   : > { %v3213_v1 = vld [vmem:[%s249_s15] sm:$0xff]  ;;  %v3215_v2 = vld [vmem:[%s249_s15 + $0x8] sm:$0xff]  ;;  %v3217_v3 = vld [vmem:[%s249_s15 + $0x10] sm:$0xff]  ;;  %s2597_s13 = sshll.u32 %s242_s12, 5  ;;  %s3060_s29 = scalar_lea.vmem %s3059_s28, 1024 }
  0x1d   : > { %v263_v4 = vpack.c.bf16 %v3215_v2, %v3213_v1  ;;  %v3221_v5 = vld [vmem:[%s249_s15 + $0x18] sm:$0xff]  ;;  %v3225_v7 = vld [vmem:[%s249_s15 + $0x20] sm:$0xff]  ;;  %v3227_v8 = vld [vmem:[%s249_s15 + $0x28] sm:$0xff]  ;;  %s244_s14 = scalar_lea.vmem [#allocation2], %s2597_s13 }
  0x1e   : > { %v264_v6 = vpack.c.bf16 %v3221_v5, %v3217_v3  ;;  %v3229_v9 = vld [vmem:[%s249_s15 + $0x30] sm:$0xff]  ;;  %v265_v10 = vpack.c.bf16 %v3227_v8, %v3225_v7  ;;  %v3236_v12 = vld [vmem:[%s249_s15 + $0x38] sm:$0xff]  ;;  %v3239_v13 = vld [vmem:[%s249_s15 + $0x40] sm:$0xff]  ;;  %s2531_s16 = sshll.u32 %s244_s14, 4  ;;  %s4335_s16 = int_to_ptr.vmem [resolvable:$true] %s2531_s16 }
  0x1f   : > { %2811 = vmatprep.subr.bf16.mxu0 %v263_v4  ;;  %2947 = vmatprep.subr.bf16.mxu1 %v263_v4  ;;  %v3241_v14 = vld [vmem:[%s249_s15 + $0x48] sm:$0xff]  ;;  %v266_v15 = vpack.c.bf16 %v3236_v12, %v3229_v9  ;;  %v3245_v16 = vld [vmem:[%s249_s15 + $0x50] sm:$0xff]  ;;  %v3247_v17 = vld [vmem:[%s249_s15 + $0x58] sm:$0xff]  ;;  %v2657_v33 = vcombine.high %v3217_v3, %v3229_v9  ;;  %v930_v34 = vcombine.low %v3217_v3, %v3229_v9  ;;  %s2719_s15 = sshll.u32 %s3177_s25, 9  ;;  %s4339_s25 = scalar_lea.sflag [#allocation3], %s242_s12 }
  0x20   : > { %2812 = vmatpush3.bf16.msra.mxu0 %v263_v4  ;;  %2953 = vmatpush3.bf16.msra.mxu1 %v263_v4  ;;  %v267_v18 = vpack.c.bf16 %v3241_v14, %v3239_v13  ;;  %v268_v19 = vpack.c.bf16 %v3247_v17, %v3245_v16  ;;  %s4333_s19 = scalar_lea.hbm %s4386_s6, %s2719_s15  ;;  %s3054_s20 = scalar_lea.vmem %s4335_s16, 512 }
  0x21   : > { %2813 = vmatprep.subr.bf16.mxu0 %v264_v6  ;;  %2948 = vmatprep.subr.bf16.mxu1 %v264_v6  ;;  %p3055_p11 = scmp.ne.s32.totalorder %s4335_s16, %s3054_s20  ;;  %p3061_p0 = scmp.lt.s32.totalorder %s4335_s16, %s3059_s28 }
  0x22   : > { %1162 = vxpose.xlu1.b32.start [1/6] (short) (narrow) %v2657_v33, 32  ;;  %1130 = vxpose.xlu0.b32.start [1/6] (short) (narrow) %v930_v34, 32  ;;  %p3062_p1 = scmp.lt.s32.totalorder %s3060_s29, %s3054_s20 }
  0x23   : > { %p3056_p12 = pnand %p3055_p11, %p3194_p5 }
  0x24   : > { %2814 = vmatpush3.bf16.msra.mxu0 %v264_v6  ;;  %2954 = vmatpush3.bf16.msra.mxu1 %v264_v6  ;;  %p3063_p2 = por %p3062_p1, %p3061_p0 }
  0x25   : > { %2815 = vmatprep.subr.bf16.mxu0 %v265_v10  ;;  %2949 = vmatprep.subr.bf16.mxu1 %v265_v10  ;;  %p3057_p13 = pneg %p3056_p12 }
  0x27   : > { %p3064_p3 = pnand %p3063_p2, %p3057_p13 }
  0x28   : > { %2816 = vmatpush3.bf16.msra.mxu0 %v265_v10  ;;  %2955 = vmatpush3.bf16.msra.mxu1 %v265_v10 }
  0x29   : > { %2817 = vmatprep.subr.bf16.mxu0 %v266_v15  ;;  %2950 = vmatprep.subr.bf16.mxu1 %v266_v15 }
  0x2c   : > { %2818 = vmatpush3.bf16.msra.mxu0 %v266_v15  ;;  %2956 = vmatpush3.bf16.msra.mxu1 %v266_v15  ;;  %v3041_v15 = vld [vmem:[%s4383_s3 + $0x8] sm:$0xff]  }
  0x2d   : > { %2819 = vmatprep.subr.bf16.mxu0 %v267_v18  ;;  %2951 = vmatprep.subr.bf16.mxu1 %v267_v18 }
  0x30   : > { %2820 = vmatpush3.bf16.msra.mxu0 %v267_v18  ;;  %2957 = vmatpush3.bf16.msra.mxu1 %v267_v18 }
  0x31   : > { %2821 = vmatprep.subr.bf16.mxu0 %v268_v19  ;;  %2952 = vmatprep.subr.bf16.mxu1 %v268_v19 }
  0x34   : > { %2822 = vmatpush3.bf16.msra.mxu0 %v268_v19  ;;  %2958 = vmatpush3.bf16.msra.mxu1 %v268_v19 }
  0x35   : > { %2847 = vmatprep.subr.bf16.mxu1 %v3038_v30 }
  0x37   : > { %2824 = vmatmul.mubr.msk.bf16.vlgmr.msra.gmra.mrb[0].mxu0 %vm353_vm0, %v3027_v20  ;;  %2840 = vmatmul.mubr.msk.bf16.vlgmr.msra.gmra.mrb[0].mxu1 %vm353_vm0, %v3035_v21 }
  0x38   : > { %2827 = vmatprep.mubr.msk.bf16.mxu0 %vm353_vm0, %v3028_v22  ;;  %2843 = vmatprep.mubr.msk.bf16.mxu1 %vm353_vm0, %v3036_v23 }
  0x39   : > { %2848 = vmatpush3.bf16.msra.mxu1 %v3038_v30 }
  0x3a   : > { %2849 = vmatprep.subr.bf16.mxu1 %v3039_v31 }
  0x3d   : > { %2850 = vmatpush3.bf16.msra.mxu1 %v3039_v31 }
  0x3e   : > { %2863 = vmatprep.subr.bf16.mxu1 %v3040_v32 }
  0x3f   : > { %2828 = vmatmul.mubr.msk.bf16.gmra.mrb[4].mxu0 %vm353_vm0, %v3029_v24  ;;  %2844 = vmatmul.mubr.msk.bf16.gmra.mrb[4].mxu1 %vm353_vm0, %v3037_v25 }
  0x40   : > { %2831 = vmatprep.mubr.msk.bf16.mxu0 %vm353_vm0, %v3030_v26 }
  0x47   : > { %2832 = vmatmul.mubr.msk.bf16.gmra.mrb[8].mxu0 %vm353_vm0, %v3031_v27 }
  0x48   : > { %2835 = vmatprep.mubr.msk.bf16.mxu0 %vm353_vm0, %v3032_v28 }
  0x4f   : > { %2836 = vmatmul.mubr.msk.bf16.gmra.mrb[12].mxu0 %vm353_vm0, %v3033_v29 }
 0x10a   : > { %v2825_v35 = vpop.f32.mrb[0].mxu0  ;;  %v2841_v36 = vpop.f32.mrb[0].mxu1 }
 0x10b   : > { %v424_v37 = vpop.f32.mrb[1].mxu0  ;;  %v488_v38 = vpop.f32.mrb[1].mxu1 }
 0x10c   : > { %v2826_v39 = vpop.f32.mrb[2].mxu0  ;;  %v2842_v40 = vpop.f32.mrb[2].mxu1 }
 0x10d   : > { %v520_v41 = vpack.c.bf16 %v2826_v39, %v2825_v35  ;;  %v427_v42 = vpop.f32.mrb[3].mxu0  ;;  %v528_v43 = vpack.c.bf16 %v2842_v40, %v2841_v36  ;;  %v491_v44 = vpop.f32.mrb[3].mxu1 }
 0x10e   : > { %v519_v45 = vpack.c.bf16 %v427_v42, %v424_v37  ;;  %v527_v46 = vpack.c.bf16 %v491_v44, %v488_v38 }
 0x112   : > { %v2829_v47 = vpop.f32.mrb[4].mxu0  ;;  %v2845_v48 = vpop.f32.mrb[4].mxu1 }
 0x113   : > { %v440_v49 = vpop.f32.mrb[5].mxu0  ;;  %v504_v50 = vpop.f32.mrb[5].mxu1 }
 0x114   : > { %v2830_v51 = vpop.f32.mrb[6].mxu0  ;;  %v2846_v52 = vpop.f32.mrb[6].mxu1 }
 0x115   : > { %v522_v53 = vpack.c.bf16 %v2830_v51, %v2829_v47  ;;  %v443_v54 = vpop.f32.mrb[7].mxu0  ;;  %v530_v55 = vpack.c.bf16 %v2846_v52, %v2845_v48  ;;  %v507_v56 = vpop.f32.mrb[7].mxu1 }
 0x116   : > { %v521_v57 = vpack.c.bf16 %v443_v54, %v440_v49  ;;  %v529_v58 = vpack.c.bf16 %v507_v56, %v504_v50 }
 0x11a   : > { %v2833_v59 = vpop.f32.mrb[8].mxu0 }
 0x11b   : > { %v456_v60 = vpop.f32.mrb[9].mxu0 }
 0x11c   : > { %v2834_v61 = vpop.f32.mrb[10].mxu0 }
 0x11d   : > { %v524_v62 = vpack.c.bf16 %v2834_v61, %v2833_v59  ;;  %v459_v63 = vpop.f32.mrb[11].mxu0 }
 0x11e   : > { %v523_v0 = vpack.c.bf16 %v459_v63, %v456_v60 }
 0x122   : > { %v2837_v3 = vpop.f32.mrb[12].mxu0 }
 0x123   : > { %v472_v4 = vpop.f32.mrb[13].mxu0 }
 0x124   : > { %v2838_v6 = vpop.f32.mrb[14].mxu0 }
 0x125   : > { %v526_v9 = vpack.c.bf16 %v2838_v6, %v2837_v3  ;;  %v475_v10 = vpop.f32.mrb[15].mxu0 }
 0x126   : > { %v525_v11 = vpack.c.bf16 %v475_v10, %v472_v4 }
 0x128   : > { %2851 = vmatprep.mubr.msk.bf16.mxu1 %vm547_vm1, %v525_v11 }
 0x129   : > { %2852 = vmatmul.mubr.msk.bf16.vlgmr.msra.gmra.mrb[8].mxu1 %vm547_vm1, %v526_v9 }
 0x12a   : > { %2864 = vmatpush3.bf16.msra.mxu1 %v3040_v32  ;;  %2855 = vmatprep.mubr.msk.bf16.mxu1 %vm547_vm1, %v527_v46 }
 0x12b   : > { %2865 = vmatprep.subr.bf16.mxu1 %v3041_v15 }
 0x12e   : > { %2866 = vmatpush3.bf16.msra.mxu1 %v3041_v15 }
 0x131   : > { %2856 = vmatmul.mubr.msk.bf16.gmra.mrb[12].mxu1 %vm547_vm1, %v528_v43 }
 0x132   : > { %2859 = vmatprep.mubr.msk.bf16.mxu1 %vm547_vm1, %v529_v58 }
 0x139   : > { %2860 = vmatmul.mubr.msk.bf16.gmra.mrb[16].mxu1 %vm547_vm1, %v530_v55 }
 0x13a   : > { %2867 = vmatprep.mubr.msk.bf16.mxu1 %vm547_vm1, %v519_v45 }
 0x141   : > { %2868 = vmatmul.mubr.msk.bf16.vlgmr.msra.gmra.mrb[20].mxu1 %vm547_vm1, %v520_v41 }
 0x142   : > { %2871 = vmatprep.mubr.msk.bf16.mxu1 %vm547_vm1, %v521_v57 }
 0x149   : > { %2872 = vmatmul.mubr.msk.bf16.gmra.mrb[24].mxu1 %vm547_vm1, %v522_v53 }
 0x14a   : > { %2875 = vmatprep.mubr.msk.bf16.mxu1 %vm547_vm1, %v523_v0 }
 0x151   : > { %2876 = vmatmul.mubr.msk.bf16.gmra.mrb[28].mxu1 %vm547_vm1, %v524_v62 }
 0x152   : > { %2879 = vmatprep.mubr.msk.bf16.mxu1 %vm547_vm1, %v525_v11 }
 0x159   : > { %2880 = vmatmul.mubr.msk.bf16.gmra.mrb[32].mxu1 %vm547_vm1, %v526_v9 }
 0x15a   : > { %2883 = vmatprep.mubr.msk.bf16.mxu1 %vm547_vm1, %v527_v46 }
 0x161   : > { %2884 = vmatmul.mubr.msk.bf16.gmra.mrb[36].mxu1 %vm547_vm1, %v528_v43 }
 0x162   : > { %2887 = vmatprep.mubr.msk.bf16.mxu1 %vm547_vm1, %v529_v58 }
 0x169   : > { %2888 = vmatmul.mubr.msk.bf16.gmra.mrb[40].mxu1 %vm547_vm1, %v530_v55 }
 0x1fc   : > { %v2853_v18 = vpop.f32.mrb[8].mxu1 }
 0x1fd   : > { %v3327_v19 = vpop.f32.mrb[9].mxu1  ;;  %v2658_v20 = vcombine.high %v3245_v16, %v2853_v18  ;;  %v931_v21 = vcombine.low %v3245_v16, %v2853_v18 }
 0x1fe   : > { %v3331_v22 = vpop.f32.mrb[10].mxu1 }
 0x1ff   : > { %1163 = vxpose.xlu1.b32.cont [2/6] (short) (narrow) %v2658_v20, 32  ;;  %1131 = vxpose.xlu0.b32.cont [2/6] (short) (narrow) %v931_v21, 32  ;;  %v3333_v23 = vpop.f32.mrb[11].mxu1 }
 0x204   : > { %v2857_v24 = vpop.f32.mrb[12].mxu1 }
 0x205   : > { %v3335_v25 = vpop.f32.mrb[13].mxu1 }
 0x206   : > { %v3337_v26 = vpop.f32.mrb[14].mxu1 }
 0x207   : > { %v3339_v27 = vpop.f32.mrb[15].mxu1 }
 0x20c   : > { %v2861_v28 = vpop.f32.mrb[16].mxu1 }
 0x20d   : > { %v3341_v29 = vpop.f32.mrb[17].mxu1  ;;  %v2659_v30 = vcombine.high %v2857_v24, %v2861_v28  ;;  %v932_v31 = vcombine.low %v2857_v24, %v2861_v28 }
 0x20e   : > { %v908_v16 = vcombine.low %v3335_v25, %v3341_v29  ;;  %v2647_v32 = vcombine.high %v3335_v25, %v3341_v29  ;;  %v3347_v33 = vpop.f32.mrb[18].mxu1 }
 0x20f   : > { %v944_v34 = vcombine.low %v3337_v26, %v3347_v33  ;;  %v2665_v35 = vcombine.high %v3337_v26, %v3347_v33  ;;  %1164 = vxpose.xlu1.b32.cont [3/6] (short) (narrow) %v2659_v30, 32  ;;  %1132 = vxpose.xlu0.b32.cont [3/6] (short) (narrow) %v932_v31, 32  ;;  %v3353_v36 = vpop.f32.mrb[19].mxu1 }
 0x210   : > { %v920_v37 = vcombine.low %v3339_v27, %v3353_v36  ;;  %v2653_v38 = vcombine.high %v3339_v27, %v3353_v36 }
 0x214   : > { %v2869_v39 = vpop.f32.mrb[20].mxu1 }
 0x215   : > { %v3359_v40 = vpop.f32.mrb[21].mxu1 }
 0x216   : > { %v3361_v41 = vpop.f32.mrb[22].mxu1 }
 0x217   : > { %v3363_v42 = vpop.f32.mrb[23].mxu1 }
 0x21c   : > { %v2873_v43 = vpop.f32.mrb[24].mxu1 }
 0x21d   : > { %v731_v44 = vpop.f32.mrb[25].mxu1  ;;  %v2660_v45 = vcombine.high %v2869_v39, %v2873_v43  ;;  %v933_v46 = vcombine.low %v2869_v39, %v2873_v43 }
 0x21e   : > { %v909_v47 = vcombine.low %v3359_v40, %v731_v44  ;;  %v2648_v48 = vcombine.high %v3359_v40, %v731_v44  ;;  %v3367_v49 = vpop.f32.mrb[26].mxu1  ;;  %v2645_v44 = vcombine.high %v3213_v1, %v3225_v7 }
 0x21f   : > { %v945_v50 = vcombine.low %v3361_v41, %v3367_v49  ;;  %v2666_v51 = vcombine.high %v3361_v41, %v3367_v49  ;;  %1165 = vxpose.xlu1.b32.cont [4/6] (short) (narrow) %v2660_v45, 32  ;;  %1133 = vxpose.xlu0.b32.cont [4/6] (short) (narrow) %v933_v46, 32  ;;  %v3373_v52 = vpop.f32.mrb[27].mxu1 }
 0x220   : > { %v921_v53 = vcombine.low %v3363_v42, %v3373_v52  ;;  %v2654_v54 = vcombine.high %v3363_v42, %v3373_v52 }
 0x224   : > { %v2877_v55 = vpop.f32.mrb[28].mxu1 }
 0x225   : > { %v747_v56 = vpop.f32.mrb[29].mxu1 }
 0x226   : > { %v3379_v57 = vpop.f32.mrb[30].mxu1 }
 0x227   : > { %v750_v58 = vpop.f32.mrb[31].mxu1 }
 0x22c   : > { %v2881_v59 = vpop.f32.mrb[32].mxu1 }
 0x22d   : > { %v763_v60 = vpop.f32.mrb[33].mxu1  ;;  %v2661_v61 = vcombine.high %v2877_v55, %v2881_v59  ;;  %v934_v62 = vcombine.low %v2877_v55, %v2881_v59 }
 0x22e   : > { %v910_v63 = vcombine.low %v747_v56, %v763_v60  ;;  %v2649_v0 = vcombine.high %v747_v56, %v763_v60  ;;  %v3381_v3 = vpop.f32.mrb[34].mxu1  ;;  %v906_v56 = vcombine.low %v3213_v1, %v3225_v7  ;;  %v907_v60 = vcombine.low %v3239_v13, %v3327_v19 }
 0x22f   : > { %v946_v4 = vcombine.low %v3379_v57, %v3381_v3  ;;  %v2667_v6 = vcombine.high %v3379_v57, %v3381_v3  ;;  %1166 = vxpose.xlu1.b32.cont [5/6] (short) (narrow) %v2661_v61, 32  ;;  %1134 = vxpose.xlu0.b32.cont [5/6] (short) (narrow) %v934_v62, 32  ;;  %v766_v9 = vpop.f32.mrb[35].mxu1  ;;  %v2646_v61 = vcombine.high %v3239_v13, %v3327_v19  ;;  %v3468_v3 = vld [vmem:[%s4384_s4] sm:$0xff]  }
 0x230   : > { %v922_v10 = vcombine.low %v750_v58, %v766_v9  ;;  %v2655_v11 = vcombine.high %v750_v58, %v766_v9  ;;  %v2651_v1 = vcombine.high %v3215_v2, %v3227_v8  ;;  %v918_v7 = vcombine.low %v3215_v2, %v3227_v8 }
 0x231   : > { %v919_v13 = vcombine.low %v3241_v14, %v3333_v23  ;;  %v2652_v19 = vcombine.high %v3241_v14, %v3333_v23  ;;  %v2663_v2 = vcombine.high %v3221_v5, %v3236_v12  ;;  %v942_v8 = vcombine.low %v3221_v5, %v3236_v12  ;;  %v3042_v5 = vld [vmem:[%s4384_s4 + $0x18] sm:$0xff]   ;;  %v3043_v12 = vld [vmem:[%s4384_s4 + $0x20] sm:$0xff]  }
 0x232   : > { %v943_v14 = vcombine.low %v3247_v17, %v3331_v22  ;;  %v2664_v23 = vcombine.high %v3247_v17, %v3331_v22  ;;  %2891 = vmatprep.subr.bf16.mxu0 %v3042_v5  ;;  %v3044_v17 = vld [vmem:[%s4384_s4 + $0x28] sm:$0xff]  }
 0x233   : > { %2892 = vmatpush3.bf16.msra.mxu0 %v3042_v5 }
 0x234   : > { %v2885_v15 = vpop.f32.mrb[36].mxu1  ;;  %2893 = vmatprep.subr.bf16.mxu0 %v3043_v12 }
 0x235   : > { %v779_v18 = vpop.f32.mrb[37].mxu1 }
 0x236   : > { %v3387_v20 = vpop.f32.mrb[38].mxu1 }
 0x237   : > { %v782_v21 = vpop.f32.mrb[39].mxu1  ;;  %2894 = vmatpush3.bf16.msra.mxu0 %v3043_v12 }
 0x238   : > { %2895 = vmatprep.subr.bf16.mxu0 %v3044_v17 }
 0x23b   : > { %2896 = vmatpush3.bf16.msra.mxu0 %v3044_v17 }
 0x23c   : > { %v2889_v24 = vpop.f32.mrb[40].mxu1  ;;  %2905 = vmatprep.subr.bf16.mxu0 %v3468_v3 }
 0x23d   : > { %v795_v28 = vpop.f32.mrb[41].mxu1  ;;  %v2662_v30 = vcombine.high %v2885_v15, %v2889_v24  ;;  %v935_v31 = vcombine.low %v2885_v15, %v2889_v24 }
 0x23e   : > { %v911_v39 = vcombine.low %v779_v18, %v795_v28  ;;  %v2650_v40 = vcombine.high %v779_v18, %v795_v28  ;;  %v2890_v43 = vpop.f32.mrb[42].mxu1 }
 0x23f   : > { %v947_v45 = vcombine.low %v3387_v20, %v2890_v43  ;;  %v2668_v46 = vcombine.high %v3387_v20, %v2890_v43  ;;  %1167 = vxpose.xlu1.b32.end [6/6] (short) (narrow) %v2662_v30, 32  ;;  %1135 = vxpose.xlu0.b32.end [6/6] (short) (narrow) %v935_v31, 32  ;;  %v798_v55 = vpop.f32.mrb[43].mxu1 }
 0x240   : > { %v923_v58 = vcombine.low %v782_v21, %v798_v55  ;;  %v2656_v59 = vcombine.high %v782_v21, %v798_v55 }
 0x243   : > { %1034 = vxpose.xlu1.b32.start [1/6] (short) (narrow) %v2645_v44, 32  ;;  %1002 = vxpose.xlu0.b32.start [1/6] (short) (narrow) %v906_v56, 32 }
 0x247   : > { %1035 = vxpose.xlu1.b32.cont [2/6] (short) (narrow) %v2646_v61, 32  ;;  %1003 = vxpose.xlu0.b32.cont [2/6] (short) (narrow) %v907_v60, 32 }
 0x24b   : > { %1036 = vxpose.xlu1.b32.cont [3/6] (short) (narrow) %v2647_v32, 32  ;;  %1004 = vxpose.xlu0.b32.cont [3/6] (short) (narrow) %v908_v16, 32 }
 0x24f   : > { %1037 = vxpose.xlu1.b32.cont [4/6] (short) (narrow) %v2648_v48, 32  ;;  %1005 = vxpose.xlu0.b32.cont [4/6] (short) (narrow) %v909_v47, 32 }
 0x253   : > { %1038 = vxpose.xlu1.b32.cont [5/6] (short) (narrow) %v2649_v0, 32  ;;  %1006 = vxpose.xlu0.b32.cont [5/6] (short) (narrow) %v910_v63, 32 }
 0x257   : > { %1039 = vxpose.xlu1.b32.end [6/6] (short) (narrow) %v2650_v40, 32  ;;  %1007 = vxpose.xlu0.b32.end [6/6] (short) (narrow) %v911_v39, 32 }
 0x25b   : > { %1098 = vxpose.xlu1.b32.start [1/6] (short) (narrow) %v2651_v1, 32  ;;  %1066 = vxpose.xlu0.b32.start [1/6] (short) (narrow) %v918_v7, 32 }
 0x25f   : > { %1099 = vxpose.xlu1.b32.cont [2/6] (short) (narrow) %v2652_v19, 32  ;;  %1067 = vxpose.xlu0.b32.cont [2/6] (short) (narrow) %v919_v13, 32 }
 0x263   : > { %1100 = vxpose.xlu1.b32.cont [3/6] (short) (narrow) %v2653_v38, 32  ;;  %1068 = vxpose.xlu0.b32.cont [3/6] (short) (narrow) %v920_v37, 32 }
 0x267   : > { %1101 = vxpose.xlu1.b32.cont [4/6] (short) (narrow) %v2654_v54, 32  ;;  %1069 = vxpose.xlu0.b32.cont [4/6] (short) (narrow) %v921_v53, 32 }
 0x26b   : > { %1102 = vxpose.xlu1.b32.cont [5/6] (short) (narrow) %v2655_v11, 32  ;;  %1070 = vxpose.xlu0.b32.cont [5/6] (short) (narrow) %v922_v10, 32 }
 0x26f   : > { %1103 = vxpose.xlu1.b32.end [6/6] (short) (narrow) %v2656_v59, 32  ;;  %1071 = vxpose.xlu0.b32.end [6/6] (short) (narrow) %v923_v58, 32 }
 0x273   : > { %1226 = vxpose.xlu1.b32.start [1/6] (short) (narrow) %v2663_v2, 32  ;;  %1194 = vxpose.xlu0.b32.start [1/6] (short) (narrow) %v942_v8, 32 }
 0x277   : > { %1227 = vxpose.xlu1.b32.cont [2/6] (short) (narrow) %v2664_v23, 32  ;;  %1195 = vxpose.xlu0.b32.cont [2/6] (short) (narrow) %v943_v14, 32 }
 0x27b   : > { %1228 = vxpose.xlu1.b32.cont [3/6] (short) (narrow) %v2665_v35, 32  ;;  %1196 = vxpose.xlu0.b32.cont [3/6] (short) (narrow) %v944_v34, 32 }
 0x27f   : > { %1229 = vxpose.xlu1.b32.cont [4/6] (short) (narrow) %v2666_v51, 32  ;;  %1197 = vxpose.xlu0.b32.cont [4/6] (short) (narrow) %v945_v50, 32 }
 0x283   : > { %1230 = vxpose.xlu1.b32.cont [5/6] (short) (narrow) %v2667_v6, 32  ;;  %1198 = vxpose.xlu0.b32.cont [5/6] (short) (narrow) %v946_v4, 32 }
 0x287   : > { %1231 = vxpose.xlu1.b32.end [6/6] (short) (narrow) %v2668_v46, 32  ;;  %1199 = vxpose.xlu0.b32.end [6/6] (short) (narrow) %v947_v45, 32 }
 0x2ab   : > { %v1178_v22 = vpop.trf.xlu1  ;;  %v1146_v25 = vpop.trf.xlu0 }
 0x2ac   : > { %v1310_v26 = vcombine.high %v1178_v22, %v1178_v22  ;;  %v1394_v27 = vpack.c.bf16 %v1178_v22, %v1178_v22  ;;  %v1306_v29 = vcombine.high %v1146_v25, %v1146_v25  ;;  %v1386_v16 = vpack.c.bf16 %v1146_v25, %v1146_v25 }
 0x2ae   : > { %v1395_v32 = vpack.c.bf16 %v1310_v26, %v1310_v26  ;;  %v1534_v33 = vunpack.c.l.b16 %v1394_v27  ;;  %v1387_v34 = vpack.c.bf16 %v1306_v29, %v1306_v29  ;;  %v3457_v35 = vunpack.c.l.b16 %v1386_v16 }
 0x2af   : > { %v1179_v48 = vpop.trf.xlu1  ;;  %v1147_v54 = vpop.trf.xlu0 }
 0x2b0   : > { %v1535_v36 = vunpack.c.l.b16 %v1395_v32  ;;  %v2289_v37 = vrot.slane %v1534_v33, 3  ;;  %v1527_v38 = vunpack.c.l.b16 %v1387_v34  ;;  %v2275_v41 = vrot.slane %v3457_v35, 3 }
 0x2b1   : > { %v1311_v50 = vcombine.high %v1179_v48, %v1179_v48  ;;  %v1396_v52 = vpack.c.bf16 %v1179_v48, %v1179_v48  ;;  %v1307_v62 = vcombine.high %v1147_v54, %v1147_v54  ;;  %v1388_v63 = vpack.c.bf16 %v1147_v54, %v1147_v54 }
 0x2b2   : > { %v2290_v42 = vrot.slane %v1535_v36, 2  ;;  %v2276_v47 = vrot.slane %v1527_v38, 2  ;;  %v1635_v46 = vrot.slane %v1534_v33, 1  ;;  %v2064_v58 = vrot.slane %v1534_v33, 2 }
 0x2b3   : > { %v1397_v53 = vpack.c.bf16 %v1311_v50, %v1311_v50  ;;  %v3462_v57 = vunpack.c.l.b16 %v1396_v52  ;;  %v1389_v9 = vpack.c.bf16 %v1307_v62, %v1307_v62  ;;  %v1180_v10 = vpop.trf.xlu1  ;;  %v3476_v15 = vunpack.c.l.b16 %v1388_v63  ;;  %v1148_v24 = vpop.trf.xlu0 }
 0x2b4   : > { %v2291_v49 = vsel %vm1559_vm2, %v2290_v42, %v2289_v37  ;;  %v2277_v51 = vsel %vm1559_vm2, %v2276_v47, %v2275_v41  ;;  %v1398_v18 = vpack.c.bf16 %v1180_v10, %v1180_v10  ;;  %v1390_v31 = vpack.c.bf16 %v1148_v24, %v1148_v24 }
 0x2b5   : > { %v2292_v0 = vrot.slane %v3462_v57, 1  ;;  %v3470_v4 = vunpack.c.l.b16 %v1397_v53  ;;  %v2278_v20 = vrot.slane %v3476_v15, 1  ;;  %v3479_v21 = vunpack.c.l.b16 %v1389_v9 }
 0x2b6   : > { %v3482_v30 = vunpack.c.l.b16 %v1398_v18  ;;  %v3492_v45 = vunpack.c.l.b16 %v1390_v31  ;;  %v2065_v59 = vrot.slane %v1535_v36, 1  ;;  %v1621_v60 = vrot.slane %v3457_v35, 1 }
 0x2b7   : > { %v2293_v6 = vsel %vm1562_vm3, %v2292_v0, %v2291_v49  ;;  %v2279_v28 = vsel %vm1562_vm3, %v2278_v20, %v2277_v51  ;;  %v3487_v43 = vpop.trf.xlu1  ;;  %v3495_v56 = vpop.trf.xlu0  ;;  %v2050_v61 = vrot.slane %v3457_v35, 2  ;;  %v1847_v1 = vrot.slane %v1535_v36, 7 }
 0x2b8   : > { %v2294_v11 = vsel %vm1565_vm4, %v3470_v4, %v2293_v6  ;;  %v2280_v39 = vsel %vm1565_vm4, %v3479_v21, %v2279_v28  ;;  %v2295_v40 = vrot.slane %v3482_v30, 7  ;;  %v2281_v55 = vrot.slane %v3492_v45, 7 }
 0x2b9   : > { %v1833_v7 = vrot.slane %v1527_v38, 7  ;;  %v2051_v13 = vrot.slane %v1527_v38, 1  ;;  %v3502_v8 = vcombine.high %v1180_v10, %v1180_v10  ;;  %v1636_v23 = vsel %vm1559_vm2, %v1535_v36, %v1635_v46 }
 0x2ba   : > { %v3490_v44 = vsel %vm1568_vm5, %v2295_v40, %v2294_v11  ;;  %v3500_v19 = vsel %vm1568_vm5, %v2281_v55, %v2280_v39  ;;  %v2066_v5 = vsel %vm1559_vm2, %v2065_v59, %v2064_v58  ;;  %v1848_v12 = vsel %vm1559_vm2, %v1847_v1, %v1534_v33 }
 0x2bb   : > { %v3508_v17 = vsel %vm1559_vm2, %v1527_v38, %v1621_v60  ;;  %v3512_v22 = vsel %vm1559_vm2, %v1833_v7, %v3457_v35  ;;  %v3515_v25 = vsel %vm1559_vm2, %v2051_v13, %v2050_v61  ;;  %v3517_v27 = vcombine.high %v1148_v24, %v1148_v24 }
 0x2bc   : > { %v1637_v34 = vrot.slane %v3462_v57, 7  ;;  %v1849_v33 = vrot.slane %v3462_v57, 6  ;;  %v3523_v36 = vsel %vm1562_vm3, %v3462_v57, %v2066_v5  ;;  %v1399_v35 = vpack.c.bf16 %v3502_v8, %v3502_v8 }
 0x2bd   : > { %v1639_v48 = vrot.slane %v3470_v4, 6  ;;  %v1851_v49 = vrot.slane %v3470_v4, 5  ;;  %v2068_v50 = vrot.slane %v3470_v4, 7  ;;  %v1623_v59 = vrot.slane %v3476_v15, 7 }
 0x2be   : > { %v1638_v10 = vsel %vm1562_vm3, %v1637_v34, %v1636_v23  ;;  %v1850_v24 = vsel %vm1562_vm3, %v1849_v33, %v1848_v12 }
 0x2bf   : > { %v1640_v23 = vsel %vm1565_vm4, %v1639_v48, %v1638_v10  ;;  %v1835_v48 = vrot.slane %v3476_v15, 6  ;;  %v1837_v10 = vrot.slane %v3479_v21, 5  ;;  %v2069_v8 = vsel %vm1565_vm4, %v2068_v50, %v3523_v36 }
 0x2c3   : > { %v1050_v2 = vpop.trf.xlu1  ;;  %v1018_v26 = vpop.trf.xlu0 }
 0x2c4   : > { %v1294_v14 = vcombine.high %v1050_v2, %v1050_v2  ;;  %v1362_v29 = vpack.c.bf16 %v1050_v2, %v1050_v2  ;;  %v1290_v32 = vcombine.high %v1018_v26, %v1018_v26  ;;  %v1354_v41 = vpack.c.bf16 %v1018_v26, %v1018_v26 }
 0x2c6   : > { %v1363_v16 = vpack.c.bf16 %v1294_v14, %v1294_v14  ;;  %v3527_v37 = vunpack.c.l.b16 %v1362_v29  ;;  %v1355_v42 = vpack.c.bf16 %v1290_v32, %v1290_v32  ;;  %v3539_v0 = vunpack.c.l.b16 %v1354_v41 }
 0x2c7   : > { %v1051_v47 = vpop.trf.xlu1  ;;  %v1019_v9 = vpop.trf.xlu0  ;;  %v1852_v29 = vsel %vm1565_vm4, %v1851_v49, %v1850_v24 }
 0x2c8   : > { %v3529_v38 = vunpack.c.l.b16 %v1363_v16  ;;  %v1295_v51 = vcombine.high %v1051_v47, %v1051_v47  ;;  %v2008_v53 = vrot.slane %v3527_v37, 2  ;;  %v1364_v57 = vpack.c.bf16 %v1051_v47, %v1051_v47 }
 0x2c9   : > { %v2233_v62 = vrot.slane %v3527_v37, 3  ;;  %v3541_v6 = vunpack.c.l.b16 %v1355_v42  ;;  %v1291_v20 = vcombine.high %v1019_v9, %v1019_v9  ;;  %v1994_v31 = vrot.slane %v3539_v0, 2 }
 0x2ca   : > { %v1791_v52 = vrot.slane %v3529_v38, 7  ;;  %v2009_v54 = vrot.slane %v3529_v38, 1  ;;  %v2234_v63 = vrot.slane %v3529_v38, 2  ;;  %v1365_v18 = vpack.c.bf16 %v1295_v51, %v1295_v51 }
 0x2cb   : > { %v1356_v39 = vpack.c.bf16 %v1019_v9, %v1019_v9  ;;  %v1995_v40 = vrot.slane %v3541_v6, 1  ;;  %v2219_v46 = vrot.slane %v3539_v0, 3  ;;  %v2220_v55 = vrot.slane %v3541_v6, 2 }
 0x2cc   : > { %v2010_v11 = vsel %vm1559_vm2, %v2009_v54, %v2008_v53  ;;  %v2235_v28 = vsel %vm1559_vm2, %v2234_v63, %v2233_v62  ;;  %v3551_v58 = vunpack.c.l.b16 %v1364_v57  ;;  %v1792_v60 = vsel %vm1559_vm2, %v1791_v52, %v3527_v37  ;;  %v1052_v53 = vpop.trf.xlu1 }
 0x2cd   : > { %v1777_v61 = vrot.slane %v3541_v6, 7  ;;  %v3557_v1 = vunpack.c.l.b16 %v1365_v18  ;;  %v2221_v7 = vsel %vm1559_vm2, %v2220_v55, %v2219_v46  ;;  %v1357_v14 = vpack.c.bf16 %v1291_v20, %v1291_v20 }
 0x2ce   : > { %v1793_v13 = vrot.slane %v3551_v58, 6  ;;  %v2011_v2 = vsel %vm1562_vm3, %v3551_v58, %v2010_v11  ;;  %v2236_v26 = vrot.slane %v3551_v58, 1  ;;  %v1996_v32 = vsel %vm1559_vm2, %v1995_v40, %v1994_v31 }
 0x2cf   : > { %v1795_v5 = vrot.slane %v3557_v1, 5  ;;  %v2012_v12 = vrot.slane %v3557_v1, 7  ;;  %v3570_v34 = vunpack.c.l.b16 %v1356_v39  ;;  %v1778_v33 = vsel %vm1559_vm2, %v1777_v61, %v3539_v0 }
 0x2d0   : > { %v1794_v16 = vsel %vm1562_vm3, %v1793_v13, %v1792_v60  ;;  %v2237_v47 = vsel %vm1562_vm3, %v2236_v26, %v2235_v28  ;;  %v3580_v51 = vunpack.c.l.b16 %v1357_v14  ;;  %v1624_v54 = vsel %vm1562_vm3, %v1623_v59, %v3508_v17  ;;  %v1020_v60 = vpop.trf.xlu0 }
 0x2d1   : > { %v1796_v41 = vsel %vm1565_vm4, %v1795_v5, %v1794_v16  ;;  %v2013_v42 = vsel %vm1565_vm4, %v2012_v12, %v2011_v2  ;;  %v2238_v49 = vsel %vm1565_vm4, %v3557_v1, %v2237_v47  ;;  %v1779_v52 = vrot.slane %v3570_v34, 6 }
 0x2d2   : > { %v1997_v57 = vsel %vm1562_vm3, %v3570_v34, %v1996_v32  ;;  %v2222_v62 = vrot.slane %v3570_v34, 1  ;;  %v1366_v63 = vpack.c.bf16 %v1052_v53, %v1052_v53  ;;  %v1625_v9 = vrot.slane %v3479_v21, 6 }
 0x2d3   : > { %v1780_v11 = vsel %vm1562_vm3, %v1779_v52, %v1778_v33  ;;  %v1781_v18 = vrot.slane %v3580_v51, 5  ;;  %v2053_v20 = vsel %vm1562_vm3, %v3476_v15, %v3515_v25  ;;  %v1998_v17 = vrot.slane %v3580_v51, 7 }
 0x2d4   : > { %v2223_v24 = vsel %vm1562_vm3, %v2222_v62, %v2221_v7  ;;  %v3597_v28 = vunpack.c.l.b16 %v1366_v63  ;;  %v1836_v31 = vsel %vm1562_vm3, %v1835_v48, %v3512_v22  ;;  %v2054_v39 = vrot.slane %v3479_v21, 7 }
 0x2d5   : > { %v1782_v40 = vsel %vm1565_vm4, %v1781_v18, %v1780_v11  ;;  %v2224_v46 = vsel %vm1565_vm4, %v3580_v51, %v2223_v24  ;;  %v3608_v15 = vunpack.c.l.b16 %v1399_v35  ;;  %v1641_v25 = vrot.slane %v3482_v30, 5  ;;  %v1021_v18 = vpop.trf.xlu0 }
 0x2d6   : > { %v1999_v55 = vsel %vm1565_vm4, %v1998_v17, %v1997_v57  ;;  %v1797_v59 = vrot.slane %v3597_v28, 4  ;;  %v1853_v22 = vrot.slane %v3482_v30, 4  ;;  %v2014_v21 = vrot.slane %v3597_v28, 6 }
 0x2d7   : > { %v2239_v61 = vrot.slane %v3597_v28, 7  ;;  %v1358_v7 = vpack.c.bf16 %v1020_v60, %v1020_v60  ;;  %v3621_v35 = vsel %vm1565_vm4, %v1625_v9, %v1624_v54  ;;  %v1391_v13 = vpack.c.bf16 %v3517_v27, %v3517_v27 }
 0x2d8   : > { %v3626_v2 = vsel %vm1568_vm5, %v1797_v59, %v1796_v41  ;;  %v3629_v14 = vsel %vm1565_vm4, %v1837_v10, %v1836_v31  ;;  %v1579_v5 = vrot.slane %v3527_v37, 1  ;;  %v3633_v12 = vsel %vm1568_vm5, %v2014_v21, %v2013_v42  ;;  %v3653_v41 = vpop.trf.xlu1 }
 0x2d9   : > { %v3636_v4 = vsel %vm1568_vm5, %v2239_v61, %v2238_v49  ;;  %v3639_v36 = vsel %vm1565_vm4, %v2054_v39, %v2053_v20  ;;  %v2070_v27 = vrot.slane %v3482_v30, 6  ;;  %v3643_v26 = vunpack.c.l.b16 %v1358_v7 }
 0x2da   : > { %v3646_v16 = vsel %vm1568_vm5, %v1641_v25, %v1640_v23  ;;  %v3649_v37 = vsel %vm1568_vm5, %v1853_v22, %v1852_v29  ;;  %v1558_v47 = vrot.slane %v3539_v0, 1  ;;  %v1581_v30 = vrot.slane %v3551_v58, 7 }
 0x2db   : > { %v1783_v48 = vrot.slane %v3643_v26, 4  ;;  %v1580_v23 = vsel %vm1559_vm2, %v3529_v38, %v1579_v5  ;;  %v1296_v49 = vcombine.high %v1052_v53, %v1052_v53  ;;  %v2000_v29 = vrot.slane %v3643_v26, 6 }
 0x2dc   : > { %v2225_v52 = vrot.slane %v3643_v26, 7  ;;  %v3664_v54 = vsel %vm1568_vm5, %v2070_v27, %v2069_v8  ;;  %v3666_v57 = vunpack.c.l.b16 %v1391_v13  ;;  %v3670_v0 = vcombine.high %v3487_v43, %v3487_v43  ;;  %v1114_v9 = vpop.trf.xlu1  ;;  %v1082_v13 = vpop.trf.xlu0 }
 0x2dd   : > { %4399 = vst [vmem:[#allocation5_spill] sm:$0xff] %v3664_v54  ;;  %v3673_v58 = vsel %vm1568_vm5, %v1783_v48, %v1782_v40  ;;  %v1583_v62 = vrot.slane %v3557_v1, 6  ;;  %v1561_v38 = vrot.slane %v3570_v34, 7  ;;  %v3678_v53 = vsel %vm1568_vm5, %v2000_v29, %v1999_v55 }
 0x2de   : > { %v3681_v63 = vsel %vm1568_vm5, %v2225_v52, %v2224_v46  ;;  %v1560_v10 = vsel %vm1559_vm2, %v3541_v6, %v1558_v47  ;;  %v1582_v11 = vsel %vm1562_vm3, %v1581_v30, %v1580_v23  ;;  %v1302_v20 = vcombine.high %v1114_v9, %v1114_v9 }
 0x2df   : > { %v1378_v17 = vpack.c.bf16 %v1114_v9, %v1114_v9  ;;  %v1627_v24 = vrot.slane %v3492_v45, 5  ;;  %v1629_v1 = vrot.slane %v3666_v57, 4  ;;  %v1400_v34 = vpack.c.bf16 %v3487_v43, %v3487_v43 }
 0x2e0   : > { %v1367_v31 = vpack.c.bf16 %v1296_v49, %v1296_v49  ;;  %v1839_v39 = vrot.slane %v3492_v45, 4  ;;  %v2056_v46 = vrot.slane %v3492_v45, 6  ;;  %v1292_v6 = vcombine.high %v1020_v60, %v1020_v60  ;;  %v1115_v49 = vpop.trf.xlu1 }
 0x2e1   : > { %v1584_v55 = vsel %vm1565_vm4, %v1583_v62, %v1582_v11  ;;  %v1563_v59 = vsel %vm1562_vm3, %v1561_v38, %v1560_v10  ;;  %v1564_v22 = vrot.slane %v3580_v51, 6  ;;  %v1297_v21 = vcombine.high %v3653_v41, %v3653_v41 }
 0x2e2   : > { %v1293_v61 = vcombine.high %v1021_v18, %v1021_v18  ;;  %v1379_v7 = vpack.c.bf16 %v1302_v20, %v1302_v20  ;;  %v3699_v8 = vunpack.c.l.b16 %v1378_v17  ;;  %v3701_v5 = vunpack.c.l.b16 %v1367_v31 }
 0x2e3   : > { %v1585_v60 = vrot.slane %v3597_v28, 5  ;;  %v1298_v27 = vcombine.high %v1082_v13, %v1082_v13  ;;  %v1370_v47 = vpack.c.bf16 %v1082_v13, %v1082_v13  ;;  %v1359_v30 = vpack.c.bf16 %v1292_v6, %v1292_v6 }
 0x2e4   : > { %v1368_v48 = vpack.c.bf16 %v3653_v41, %v3653_v41  ;;  %v3706_v23 = vunpack.c.l.b16 %v1379_v7  ;;  %v2261_v51 = vrot.slane %v3699_v8, 3  ;;  %v1360_v29 = vpack.c.bf16 %v1021_v18, %v1021_v18 }
 0x2e5   : > { %v1371_v52 = vpack.c.bf16 %v1298_v27, %v1298_v27  ;;  %v3709_v62 = vunpack.c.l.b16 %v1370_v47  ;;  %v1303_v38 = vcombine.high %v1115_v49, %v1115_v49  ;;  %v1369_v9 = vpack.c.bf16 %v1297_v21, %v1297_v21 }
 0x2e6   : > { %v1361_v10 = vpack.c.bf16 %v1293_v61, %v1293_v61  ;;  %v2262_v28 = vrot.slane %v3706_v23, 2  ;;  %v1380_v11 = vpack.c.bf16 %v1115_v49, %v1115_v49  ;;  %v1566_v20 = vsel %vm1565_vm4, %v1564_v22, %v1563_v59 }
 0x2e7   : > { %v1567_v41 = vrot.slane %v3643_v26, 5  ;;  %v3714_v17 = vunpack.c.l.b16 %v1371_v52  ;;  %v2247_v31 = vrot.slane %v3709_v62, 3  ;;  %v1586_v18 = vsel %vm1568_vm5, %v1585_v60, %v1584_v55  ;;  %v1083_v60 = vpop.trf.xlu0 }
 0x2e8   : > { %v1587_v6 = vrot.slane %v3701_v5, 4  ;;  %v3719_v7 = vunpack.c.l.b16 %v1359_v30  ;;  %v2263_v21 = vsel %vm1559_vm2, %v2262_v28, %v2261_v51  ;;  %v3722_v61 = vunpack.c.l.b16 %v1368_v48 }
 0x2e9   : > { %v3724_v13 = vunpack.c.l.b16 %v1360_v29  ;;  %v2248_v26 = vrot.slane %v3714_v17, 2  ;;  %v1381_v59 = vpack.c.bf16 %v1303_v38, %v1303_v38  ;;  %v3728_v27 = vunpack.c.l.b16 %v1369_v9 }
 0x2ea   : > { %v1570_v22 = vrot.slane %v3719_v7, 4  ;;  %v3730_v47 = vunpack.c.l.b16 %v1361_v10  ;;  %v3732_v55 = vunpack.c.l.b16 %v1380_v11  ;;  %v1569_v30 = vsel %vm1568_vm5, %v1567_v41, %v1566_v20  ;;  %v1116_v41 = vpop.trf.xlu1 }
 0x2eb   : > { %v1589_v51 = vrot.slane %v3722_v61, 3  ;;  %v1573_v48 = vrot.slane %v3724_v13, 3  ;;  %v2249_v49 = vsel %vm1559_vm2, %v2248_v26, %v2247_v31  ;;  %v1591_v52 = vrot.slane %v3728_v27, 2 }
 0x2ec   : > { %v1576_v38 = vrot.slane %v3730_v47, 2  ;;  %v2264_v9 = vrot.slane %v3732_v55, 1  ;;  %v1401_v10 = vpack.c.bf16 %v3670_v0, %v3670_v0  ;;  %v1607_v28 = vrot.slane %v3699_v8, 1 }
 0x2ed   : > { %v3745_v11 = vunpack.c.l.b16 %v1381_v59  ;;  %v1299_v20 = vcombine.high %v1083_v60, %v1083_v60  ;;  %v1372_v31 = vpack.c.bf16 %v1083_v60, %v1083_v60  ;;  %v1572_v26 = vsel %vm1571_vm6, %v1570_v22, %v1569_v30  ;;  %v1084_v60 = vpop.trf.xlu0 }
 0x2ee   : > { %v2265_v33 = vsel %vm1562_vm3, %v2264_v9, %v2263_v21  ;;  %v1588_v25 = vsel %vm1571_vm6, %v1587_v6, %v1586_v18  ;;  %v1575_v32 = vsel %vm1574_vm7, %v1573_v48, %v1572_v26  ;;  %v1304_v21 = vcombine.high %v1116_v41, %v1116_v41  ;;  %v1117_v30 = vpop.trf.xlu1 }
 0x2ef   : > { %v2266_v42 = vsel %vm1565_vm4, %v3745_v11, %v2265_v33  ;;  %v1373_v29 = vpack.c.bf16 %v1299_v20, %v1299_v20  ;;  %v1590_v0 = vsel %vm1574_vm7, %v1589_v51, %v1588_v25  ;;  %v3754_v40 = vunpack.c.l.b16 %v1372_v31 }
 0x2f0   : > { %v1578_v59 = vsel %vm1577_vm8, %v1576_v38, %v1575_v32  ;;  %v1592_v50 = vsel %vm1577_vm8, %v1591_v52, %v1590_v0  ;;  %v3762_v18 = vsel %vm1568_vm5, %v1627_v24, %v3621_v35  ;;  %v3767_v33 = vunpack.c.l.b16 %v1400_v34 }
 0x2f1   : > { %v1677_v25 = vpack.c.b16 %v1592_v50, %v1578_v59  ;;  %v1382_v6 = vpack.c.bf16 %v1116_v41, %v1116_v41  ;;  %v3773_v32 = vsel %vm1568_vm5, %v1839_v39, %v3629_v14  ;;  %v3779_v22 = vsel %vm1568_vm5, %v2056_v46, %v3639_v36  ;;  %v1085_v26 = vpop.trf.xlu0 }
 0x2f2   : > { %4400 = vst [vmem:[#allocation6_spill] sm:$0xff] %v3779_v22  ;;  %v1609_v35 = vrot.slane %v3732_v55, 7  ;;  %v2250_v43 = vrot.slane %v3754_v40, 1  ;;  %v1608_v50 = vsel %vm1559_vm2, %v3706_v23, %v1607_v28  ;;  %v3785_v24 = vunpack.c.l.b16 %v1373_v29 }
 0x2f3   : > { %2897 = vmatprep.mubr.msk.bf16.mxu0 %vm1699_vm9, %v1677_v25  ;;  %v1383_v34 = vpack.c.bf16 %v1304_v21, %v1304_v21  ;;  %v1300_v14 = vcombine.high %v1084_v60, %v1084_v60  ;;  %v3788_v39 = vunpack.c.l.b16 %v1401_v10  ;;  %v1309_v45 = vcombine.high %v3495_v56, %v3495_v56 }
 0x2f4   : > { %v1392_v36 = vpack.c.bf16 %v3495_v56, %v3495_v56  ;;  %v2251_v46 = vsel %vm1562_vm3, %v2250_v43, %v2249_v49  ;;  %v3799_v52 = vunpack.c.l.b16 %v1382_v6  ;;  %v1593_v38 = vrot.slane %v3709_v62, 1 }
 0x2f5   : > { %v2252_v29 = vsel %vm1565_vm4, %v3785_v24, %v2251_v46  ;;  %v1610_v9 = vsel %vm1562_vm3, %v1609_v35, %v1608_v50  ;;  %v1611_v10 = vrot.slane %v3745_v11, 6  ;;  %v3804_v28 = vunpack.c.l.b16 %v1383_v34 }
 0x2f6   : > { %v2267_v56 = vrot.slane %v3799_v52, 7  ;;  %v1374_v49 = vpack.c.bf16 %v1084_v60, %v1084_v60  ;;  %v1375_v20 = vpack.c.bf16 %v1300_v14, %v1300_v14  ;;  %v1305_v41 = vcombine.high %v1117_v30, %v1117_v30 }
 0x2f7   : > { %v1393_v0 = vpack.c.bf16 %v1309_v45, %v1309_v45  ;;  %v3809_v59 = vunpack.c.l.b16 %v1392_v36  ;;  %v1595_v25 = vrot.slane %v3754_v40, 7  ;;  %v2269_v35 = vrot.slane %v3804_v28, 6 }
 0x2f8   : > { %v2268_v6 = vsel %vm1568_vm5, %v2267_v56, %v2266_v42  ;;  %v1594_v60 = vsel %vm1559_vm2, %v3714_v17, %v1593_v38  ;;  %v1612_v43 = vsel %vm1565_vm4, %v1611_v10, %v1610_v9  ;;  %v1613_v50 = vrot.slane %v3799_v52, 5 }
 0x2f9   : > { %v3819_v34 = vunpack.c.l.b16 %v1374_v49  ;;  %v2270_v14 = vsel %vm1571_vm6, %v2269_v35, %v2268_v6  ;;  %v3822_v45 = vunpack.c.l.b16 %v1375_v20  ;;  %v1384_v36 = vpack.c.bf16 %v1117_v30, %v1117_v30 }
 0x2fa   : > { %v1385_v46 = vpack.c.bf16 %v1305_v41, %v1305_v41  ;;  %v3826_v56 = vunpack.c.l.b16 %v1393_v0  ;;  %v1597_v38 = vrot.slane %v3785_v24, 6  ;;  %v1596_v9 = vsel %vm1562_vm3, %v1595_v25, %v1594_v60 }
 0x2fb   : > { %v1615_v10 = vrot.slane %v3804_v28, 4  ;;  %v2253_v49 = vrot.slane %v3819_v34, 7  ;;  %v2255_v6 = vrot.slane %v3822_v45, 6  ;;  %v1614_v30 = vsel %vm1568_vm5, %v1613_v50, %v1612_v43 }
 0x2fc   : > { %v3835_v41 = vunpack.c.l.b16 %v1384_v36  ;;  %v3837_v35 = vunpack.c.l.b16 %v1385_v46  ;;  %v1599_v25 = vrot.slane %v3819_v34, 5  ;;  %v1598_v21 = vsel %vm1565_vm4, %v1597_v38, %v1596_v9  ;;  %v1242_v38 = vpop.trf.xlu1 }
 0x2fd   : > { %v2254_v60 = vsel %vm1568_vm5, %v2253_v49, %v2252_v29  ;;  %v1616_v46 = vsel %vm1571_vm6, %v1615_v10, %v1614_v30  ;;  %v1601_v0 = vrot.slane %v3822_v45, 4  ;;  %v1301_v51 = vcombine.high %v1085_v26, %v1085_v26 }
 0x2fe   : > { %4401 = vst [vmem:[#allocation7_spill] sm:$0xff] %v3835_v41  ;;  %4402 = vst [vmem:[#allocation8_spill] sm:$0xff] %v3837_v35  ;;  %v2256_v43 = vsel %vm1571_vm6, %v2255_v6, %v2254_v60  ;;  %v1617_v42 = vrot.slane %v3835_v41, 3  ;;  %v2271_v29 = vrot.slane %v3835_v41, 5  ;;  %v2273_v49 = vrot.slane %v3837_v35, 4 }
 0x2ff   : > { %v1600_v9 = vsel %vm1568_vm5, %v1599_v25, %v1598_v21  ;;  %v1376_v6 = vpack.c.bf16 %v1085_v26, %v1085_v26  ;;  %v1619_v10 = vrot.slane %v3837_v35, 2  ;;  %v1377_v50 = vpack.c.bf16 %v1301_v51, %v1301_v51 }
 0x300   : > { %v2272_v30 = vsel %vm1574_vm7, %v2271_v29, %v2270_v14  ;;  %v1618_v31 = vsel %vm1574_vm7, %v1617_v42, %v1616_v46  ;;  %v1602_v21 = vsel %vm1571_vm6, %v1601_v0, %v1600_v9  ;;  %v2036_v14 = vrot.slane %v3699_v8, 2 }
 0x301   : > { %v3863_v20 = vsel %vm1577_vm8, %v2273_v49, %v2272_v30  ;;  %v3865_v48 = vunpack.c.l.b16 %v1376_v6  ;;  %v3870_v25 = vunpack.c.l.b16 %v1377_v50  ;;  %v1620_v49 = vsel %vm1577_vm8, %v1619_v10, %v1618_v31 }
 0x302   : > { %4403 = vst [vmem:[#allocation9_spill] sm:$0xff] %v3863_v20  ;;  %v1819_v50 = vrot.slane %v3706_v23, 7  ;;  %v2037_v36 = vrot.slane %v3706_v23, 1  ;;  %v1821_v46 = vrot.slane %v3732_v55, 6  ;;  %v1823_v10 = vrot.slane %v3745_v11, 5 }
 0x303   : > { %4404 = vst [vmem:[#allocation10_spill] sm:$0xff] %v3865_v48  ;;  %4405 = vst [vmem:[#allocation11_spill] sm:$0xff] %v3870_v25  ;;  %v1603_v29 = vrot.slane %v3865_v48, 3  ;;  %v2257_v42 = vrot.slane %v3865_v48, 5  ;;  %v1605_v6 = vrot.slane %v3870_v25, 2  ;;  %v2259_v30 = vrot.slane %v3870_v25, 4 }
 0x304   : > { %v2038_v60 = vsel %vm1559_vm2, %v2037_v36, %v2036_v14  ;;  %v3047_v36 = vld [vmem:[%s4384_s4 + $0x10] sm:$0xff]   ;;  %v1410_v14 = vpack.c.bf16 %v1242_v38, %v1242_v38  ;;  %v4409_v20 = vrot.slane %v3826_v56, 2 }
 0x305   : > { %v1604_v9 = vsel %vm1574_vm7, %v1603_v29, %v1602_v21  ;;  %v2258_v51 = vsel %vm1574_vm7, %v2257_v42, %v2256_v43  ;;  %v3046_v43 = vld [vmem:[%s4384_s4 + $0x8] sm:$0xff]   ;;  %v1805_v29 = vrot.slane %v3714_v17, 7  ;;  %v1630_v42 = vsel %vm1571_vm6, %v1629_v1, %v3762_v18  ;;  %v1243_v1 = vpop.trf.xlu1 }
 0x306   : > { %v1606_v26 = vsel %vm1577_vm8, %v1605_v6, %v1604_v9  ;;  %v3888_v31 = vsel %vm1577_vm8, %v2259_v30, %v2258_v51  ;;  %v1210_v51 = vpop.trf.xlu0  ;;  %v1820_v6 = vsel %vm1559_vm2, %v1819_v50, %v3699_v8  ;;  %v2022_v30 = vrot.slane %v3709_v62, 2 }
 0x307   : > { %4406 = vst [vmem:[#allocation12_spill] sm:$0xff] %v3888_v31  ;;  %v1678_v0 = vpack.c.b16 %v1620_v49, %v1606_v26  ;;  %v2023_v9 = vrot.slane %v3714_v17, 1  ;;  %v1807_v18 = vrot.slane %v3754_v40, 6  ;;  %v1318_v49 = vcombine.high %v1242_v38, %v1242_v38 }
 0x308   : > { %v4407_v8 = vrot.slane %v3809_v59, 3  ;;  %v1314_v26 = vcombine.high %v1210_v51, %v1210_v51  ;;  %v1402_v23 = vpack.c.bf16 %v1210_v51, %v1210_v51  ;;  %v2039_v21 = vsel %vm1562_vm3, %v3732_v55, %v2038_v60 }
 0x309   : > { %2898 = vmatmul.mubr.msk.bf16.vlgmr.msra.gmra.mrb[16].mxu0 %vm1699_vm9, %v1678_v0  ;;  %v4408_v0 = vrot.slane %v3608_v15, 4  ;;  %v1412_v31 = vpack.c.bf16 %v1243_v1, %v1243_v1  ;;  %v2024_v55 = vsel %vm1559_vm2, %v2023_v9, %v2022_v30  ;;  %v1411_v60 = vpack.c.bf16 %v1318_v49, %v1318_v49 }
 0x30a   : > { %2906 = vmatpush3.bf16.msra.mxu0 %v3468_v3  ;;  %v1632_v50 = vsel %vm1574_vm7, %v4407_v8, %v1630_v42  ;;  %v1806_v3 = vsel %vm1559_vm2, %v1805_v29, %v3709_v62  ;;  %v2040_v42 = vrot.slane %v3745_v11, 7  ;;  %v1319_v8 = vcombine.high %v1243_v1, %v1243_v1  ;;  %v1211_v29 = vpop.trf.xlu0 }
 0x30b   : > { %v1644_v17 = vsel %vm1571_vm6, %v4408_v0, %v3646_v16  ;;  %2907 = vmatprep.subr.bf16.mxu0 %v3046_v43  ;;  %v1822_v16 = vsel %vm1562_vm3, %v1821_v46, %v1820_v6  ;;  %v1809_v0 = vrot.slane %v3785_v24, 5  ;;  %v1634_v54 = vsel %vm1577_vm8, %v4409_v20, %v1632_v50  ;;  %v3947_v20 = vld [vmem:[%s4384_s4 + $0x30] sm:$0xff]  }
 0x30c   : > { %v4410_v62 = vrot.slane %v3767_v33, 3  ;;  %v1808_v11 = vsel %vm1562_vm3, %v1807_v18, %v1806_v3  ;;  %v4411_v51 = vrot.slane %v3788_v39, 2  ;;  %v3949_v6 = vunpack.c.l.b16 %v1410_v14  ;;  %v1244_v14 = vpop.trf.xlu1 }
 0x30d   : > { %v1403_v1 = vpack.c.bf16 %v1314_v26, %v1314_v26  ;;  %v3951_v50 = vunpack.c.l.b16 %v1402_v23  ;;  %v1413_v30 = vpack.c.bf16 %v1319_v8, %v1319_v8  ;;  %v3953_v9 = vunpack.c.l.b16 %v1412_v31 }
 0x30e   : > { %v1646_v38 = vsel %vm1574_vm7, %v4410_v62, %v1644_v17  ;;  %2908 = vmatpush3.bf16.msra.mxu0 %v3046_v43  ;;  %v1315_v49 = vcombine.high %v1211_v29, %v1211_v29  ;;  %v1404_v18 = vpack.c.bf16 %v1211_v29, %v1211_v29  ;;  %v1824_v17 = vsel %vm1565_vm4, %v1823_v10, %v1822_v16 }
 0x30f   : > { %v1648_v46 = vsel %vm1577_vm8, %v4411_v51, %v1646_v38  ;;  %2909 = vmatprep.subr.bf16.mxu0 %v3047_v36  ;;  %4412 = vst [vmem:[#allocation13_spill] sm:$0xff] %v3953_v9  ;;  %v2041_v3 = vsel %vm1565_vm4, %v2040_v42, %v2039_v21  ;;  %v1810_v62 = vsel %vm1565_vm4, %v1809_v0, %v1808_v11  ;;  %v1825_v38 = vrot.slane %v3799_v52, 4 }
 0x310   : > { %v1679_v43 = vpack.c.b16 %v1648_v46, %v1634_v54  ;;  %v2042_v23 = vrot.slane %v3799_v52, 6  ;;  %v1811_v54 = vrot.slane %v3819_v34, 4  ;;  %v1405_v31 = vpack.c.bf16 %v1315_v49, %v1315_v49  ;;  %v1212_v46 = vpop.trf.xlu0 }
 0x311   : > { %v3962_v26 = vunpack.c.l.b16 %v1404_v18  ;;  %v3965_v10 = vunpack.c.l.b16 %v1411_v60  ;;  %v1663_v21 = vrot.slane %v3949_v6, 1  ;;  %v3968_v42 = vunpack.c.l.b16 %v1403_v1 }
 0x312   : > { %2901 = vmatprep.mubr.msk.bf16.mxu0 %vm1699_vm9, %v1679_v43  ;;  %2910 = vmatpush3.bf16.msra.mxu0 %v3047_v36  ;;  %v1649_v8 = vrot.slane %v3951_v50, 1  ;;  %v3971_v16 = vunpack.c.l.b16 %v1413_v30  ;;  %v1665_v36 = vrot.slane %v3953_v9, 7  ;;  %v3974_v52 = vunpack.c.l.b16 %v1405_v31 }
 0x313   : > { %4413 = vst [vmem:[#allocation14_spill] sm:$0xff] %v3962_v26  ;;  %2919 = vmatprep.subr.bf16.mxu0 %v3947_v20  ;;  %v1320_v0 = vcombine.high %v1244_v14, %v1244_v14  ;;  %v2025_v29 = vsel %vm1562_vm3, %v3754_v40, %v2024_v55  ;;  %v2026_v11 = vrot.slane %v3785_v24, 7  ;;  %v1651_v60 = vrot.slane %v3962_v26, 7 }
 0x314   : > { %v1414_v51 = vpack.c.bf16 %v1244_v14, %v1244_v14  ;;  %v1826_v1 = vsel %vm1568_vm5, %v1825_v38, %v1824_v17  ;;  %v1827_v43 = vrot.slane %v3804_v28, 3  ;;  %v2043_v30 = vsel %vm1568_vm5, %v2042_v23, %v2041_v3 }
 0x315   : > { %v2044_v49 = vrot.slane %v3804_v28, 5  ;;  %v1812_v18 = vsel %vm1568_vm5, %v1811_v54, %v1810_v62  ;;  %v1813_v31 = vrot.slane %v3822_v45, 3  ;;  %v1664_v40 = vsel %vm1559_vm2, %v3965_v10, %v1663_v21 }
 0x316   : > { %v1650_v24 = vsel %vm1559_vm2, %v3968_v42, %v1649_v8  ;;  %v1666_v55 = vsel %vm1562_vm3, %v1665_v36, %v1664_v40  ;;  %v1667_v17 = vrot.slane %v3971_v16, 6  ;;  %v1653_v38 = vrot.slane %v3974_v52, 6  ;;  %v1245_v40 = vpop.trf.xlu1 }
 0x317   : > { %v1415_v14 = vpack.c.bf16 %v1320_v0, %v1320_v0  ;;  %v1652_v3 = vsel %vm1562_vm3, %v1651_v60, %v1650_v24  ;;  %v3994_v28 = vunpack.c.l.b16 %v1414_v51  ;;  %v1316_v62 = vcombine.high %v1212_v46, %v1212_v46 }
 0x318   : > { %v1406_v23 = vpack.c.bf16 %v1212_v46, %v1212_v46  ;;  %v3998_v21 = vsel %vm1565_vm4, %v2026_v11, %v2025_v29  ;;  %v1828_v8 = vsel %vm1571_vm6, %v1827_v43, %v1826_v1  ;;  %v4002_v36 = vsel %vm1571_vm6, %v2044_v49, %v2043_v30  ;;  %v1213_v46 = vpop.trf.xlu0 }
 0x319   : > { %4414 = vst [vmem:[#allocation15_spill] sm:$0xff] %v4002_v36  ;;  %v1814_v22 = vsel %vm1571_vm6, %v1813_v31, %v1812_v18  ;;  %v1829_v60 = vrot.slane %v3835_v41, 2  ;;  %v1815_v51 = vrot.slane %v3865_v48, 2  ;;  %v1861_v24 = vrot.slane %v3968_v42, 7 }
 0x31a   : > { %v1668_v29 = vsel %vm1565_vm4, %v1667_v17, %v1666_v55  ;;  %v1654_v11 = vsel %vm1565_vm4, %v1653_v38, %v1652_v3  ;;  %v1407_v1 = vpack.c.bf16 %v1316_v62, %v1316_v62  ;;  %v4011_v43 = vunpack.c.l.b16 %v1415_v14 }
 0x31b   : > { %v1669_v30 = vrot.slane %v3994_v28, 5  ;;  %v4014_v49 = vunpack.c.l.b16 %v1406_v23  ;;  %v1321_v18 = vcombine.high %v1245_v40, %v1245_v40  ;;  %v1416_v54 = vpack.c.bf16 %v1245_v40, %v1245_v40 }
 0x31c   : > { %v4016_v31 = vunpack.c.l.b16 %v1407_v1  ;;  %v1317_v0 = vcombine.high %v1213_v46, %v1213_v46  ;;  %v1408_v36 = vpack.c.bf16 %v1213_v46, %v1213_v46  ;;  %v1830_v48 = vsel %vm1574_vm7, %v1829_v60, %v1828_v8 }
 0x31d   : > { %v1831_v41 = vrot.slane %v3837_v35, 1  ;;  %v1817_v55 = vrot.slane %v3870_v25, 1  ;;  %v1655_v17 = vrot.slane %v4014_v49, 5  ;;  %v1816_v38 = vsel %vm1574_vm7, %v1815_v51, %v1814_v22 }
 0x31e   : > { %v1875_v14 = vrot.slane %v3965_v10, 7  ;;  %v1862_v3 = vsel %vm1559_vm2, %v1861_v24, %v3951_v50  ;;  %v1863_v62 = vrot.slane %v3962_v26, 6  ;;  %v1670_v23 = vsel %vm1568_vm5, %v1669_v30, %v1668_v29 }
 0x31f   : > { %v1671_v40 = vrot.slane %v4011_v43, 4  ;;  %v1656_v8 = vsel %vm1568_vm5, %v1655_v17, %v1654_v11  ;;  %v1657_v60 = vrot.slane %v4016_v31, 4  ;;  %v1417_v46 = vpack.c.bf16 %v1321_v18, %v1321_v18 }
 0x320   : > { %v4031_v1 = vunpack.c.l.b16 %v1416_v54  ;;  %v1409_v25 = vpack.c.bf16 %v1317_v0, %v1317_v0  ;;  %v4033_v22 = vunpack.c.l.b16 %v1408_v36  ;;  %v1877_v51 = vrot.slane %v3953_v9, 6 }
 0x321   : > { %v1865_v24 = vrot.slane %v3974_v52, 5  ;;  %v4415_v35 = vrot.slane %v3719_v7, 3  ;;  %v4416_v11 = vrot.slane %v3701_v5, 3  ;;  %v1876_v54 = vsel %vm1559_vm2, %v1875_v14, %v3949_v6 }
 0x322   : > { %v1864_v36 = vsel %vm1562_vm3, %v1863_v62, %v1862_v3  ;;  %v4048_v0 = vunpack.c.l.b16 %v1417_v46  ;;  %v1673_v18 = vrot.slane %v4031_v1, 3  ;;  %v4051_v17 = vunpack.c.l.b16 %v1409_v25 }
 0x323   : > { %v1786_v29 = vsel %vm1571_vm6, %v4415_v35, %v3673_v58  ;;  %v1800_v30 = vsel %vm1571_vm6, %v4416_v11, %v3626_v2  ;;  %v1659_v26 = vrot.slane %v4033_v22, 3  ;;  %v1658_v58 = vsel %vm1571_vm6, %v1657_v60, %v1656_v8 }
 0x324   : > { %v1672_v35 = vsel %vm1571_vm6, %v1671_v40, %v1670_v23  ;;  %v1832_v2 = vsel %vm1577_vm8, %v1831_v41, %v1830_v48  ;;  %v1818_v14 = vsel %vm1577_vm8, %v1817_v55, %v1816_v38  ;;  %v1675_v3 = vrot.slane %v4048_v0, 2 }
 0x325   : > { %v1878_v62 = vsel %vm1562_vm3, %v1877_v51, %v1876_v54  ;;  %v1879_v46 = vrot.slane %v3971_v16, 5  ;;  %v1866_v25 = vsel %vm1565_vm4, %v1865_v24, %v1864_v36  ;;  %v1661_v11 = vrot.slane %v4051_v17, 2 }
 0x326   : > { %v1881_v8 = vrot.slane %v3994_v28, 4  ;;  %v1867_v23 = vrot.slane %v4014_v49, 4  ;;  %v1660_v40 = vsel %vm1574_vm7, %v1659_v26, %v1658_v58  ;;  %v1674_v48 = vsel %vm1574_vm7, %v1673_v18, %v1672_v35 }
 0x327   : > { %v1662_v41 = vsel %vm1577_vm8, %v1661_v11, %v1660_v40  ;;  %v1676_v55 = vsel %vm1577_vm8, %v1675_v3, %v1674_v48  ;;  %v4417_v38 = vrot.slane %v3724_v13, 2  ;;  %v4418_v51 = vrot.slane %v3722_v61, 2 }
 0x328   : > { %v1680_v54 = vpack.c.b16 %v1676_v55, %v1662_v41  ;;  %v4419_v36 = vrot.slane %v3730_v47, 1  ;;  %v4420_v26 = vrot.slane %v3728_v27, 1  ;;  %v4421_v58 = vrot.slane %v3666_v57, 3 }
 0x329   : > { %v1788_v60 = vsel %vm1574_vm7, %v4417_v38, %v1786_v29  ;;  %v1802_v24 = vsel %vm1574_vm7, %v4418_v51, %v1800_v30  ;;  %v4422_v29 = vrot.slane %v3819_v34, 6  ;;  %v1880_v30 = vsel %vm1565_vm4, %v1879_v46, %v1878_v62 }
 0x32a   : > { %v1790_v9 = vsel %vm1577_vm8, %v4419_v36, %v1788_v60  ;;  %v1804_v18 = vsel %vm1577_vm8, %v4420_v26, %v1802_v24  ;;  %v1842_v35 = vsel %vm1571_vm6, %v4421_v58, %v3773_v32  ;;  %v4423_v40 = vrot.slane %v3608_v15, 3  ;;  %2902 = vmatmul.mubr.msk.bf16.gmra.mrb[20].mxu0 %vm1699_vm9, %v1680_v54 }
 0x32b   : > { %v2029_v3 = vsel %vm1568_vm5, %v4422_v29, %v3998_v21  ;;  %v1889_v11 = vpack.c.b16 %v1804_v18, %v1790_v9  ;;  %v1890_v41 = vpack.c.b16 %v1832_v2, %v1818_v14  ;;  %v2092_v55 = vrot.slane %v3949_v6, 2 }
 0x32c   : > { %v1856_v48 = vsel %vm1571_vm6, %v4423_v40, %v3649_v37  ;;  %v1883_v38 = vrot.slane %v4011_v43, 3  ;;  %v1869_v32 = vrot.slane %v4016_v31, 3  ;;  %v1868_v34 = vsel %vm1568_vm5, %v1867_v23, %v1866_v25 }
 0x32d   : > { %2911 = vmatprep.mubr.msk.bf16.mxu0 %vm1699_vm9, %v1889_v11  ;;  %v4424_v9 = vrot.slane %v3809_v59, 2  ;;  %v4425_v62 = vrot.slane %v3767_v33, 2  ;;  %v4426_v2 = vrot.slane %v3719_v7, 5  ;;  %v2093_v46 = vrot.slane %v3965_v10, 1 }
 0x32e   : > { %v1882_v60 = vsel %vm1568_vm5, %v1881_v8, %v1880_v30  ;;  %v4427_v25 = vrot.slane %v3724_v13, 4  ;;  %v4428_v51 = vrot.slane %v3701_v5, 5  ;;  %v1885_v54 = vrot.slane %v4031_v1, 2 }
 0x32f   : > { %v1844_v21 = vsel %vm1574_vm7, %v4424_v9, %v1842_v35  ;;  %v1858_v37 = vsel %vm1574_vm7, %v4425_v62, %v1856_v48  ;;  %v2003_v14 = vsel %vm1571_vm6, %v4426_v2, %v3678_v53  ;;  %v1871_v36 = vrot.slane %v4033_v22, 2 }
 0x330   : > { %v2005_v23 = vsel %vm1574_vm7, %v4427_v25, %v2003_v14  ;;  %v2017_v24 = vsel %vm1571_vm6, %v4428_v51, %v3633_v12  ;;  %v4429_v26 = vrot.slane %v3730_v47, 3  ;;  %v4430_v8 = vrot.slane %v3722_v61, 4 }
 0x331   : > { %v4431_v58 = vrot.slane %v3826_v56, 1  ;;  %v4432_v29 = vrot.slane %v3788_v39, 1  ;;  %v1870_v30 = vsel %vm1571_vm6, %v1869_v32, %v1868_v34  ;;  %v4433_v11 = vrot.slane %v3728_v27, 3  ;;  %v3049_v32 = vld [vmem:[%s4384_s4 + $0x38] sm:$0xff]  }
 0x332   : > { %v4125_v53 = vsel %vm1577_vm8, %v4429_v26, %v2005_v23  ;;  %v2019_v18 = vsel %vm1574_vm7, %v4430_v8, %v2017_v24  ;;  %v2078_v48 = vrot.slane %v3951_v50, 2  ;;  %v2079_v9 = vrot.slane %v3968_v42, 1  ;;  %2912 = vmatmul.mubr.msk.bf16.vlgmr.msra.gmra.mrb[16].mxu0 %vm1699_vm9, %v1890_v41 }
 0x333   : > { %v1846_v35 = vsel %vm1577_vm8, %v4431_v58, %v1844_v21  ;;  %v1860_v12 = vsel %vm1577_vm8, %v4432_v29, %v1858_v37  ;;  %v2021_v40 = vsel %vm1577_vm8, %v4433_v11, %v2019_v18  ;;  %v1884_v62 = vsel %vm1571_vm6, %v1883_v38, %v1882_v60  ;;  %2920 = vmatpush3.bf16.msra.mxu0 %v3947_v20 }
 0x334   : > { %v2106_v2 = vpack.c.b16 %v2021_v40, %v4125_v53  ;;  %v2094_v21 = vsel %vm1559_vm2, %v2093_v46, %v2092_v55  ;;  %v1887_v14 = vrot.slane %v4048_v0, 1  ;;  %v1873_v37 = vrot.slane %v4051_v17, 1  ;;  %2921 = vmatprep.subr.bf16.mxu0 %v3049_v32 }
 0x335   : > { %v4434_v34 = vrot.slane %v3719_v7, 6  ;;  %v1891_v23 = vpack.c.b16 %v1860_v12, %v1846_v35  ;;  %v1872_v38 = vsel %vm1574_vm7, %v1871_v36, %v1870_v30  ;;  %v4435_v60 = vrot.slane %v3724_v13, 5 }
 0x336   : > { %v4436_v46 = vrot.slane %v3701_v5, 6  ;;  %v1886_v24 = vsel %vm1574_vm7, %v1885_v54, %v1884_v62  ;;  %v4437_v7 = vrot.slane %v3730_v47, 4  ;;  %v4438_v36 = vrot.slane %v3722_v61, 5 }
 0x337   : > { %v2228_v25 = vsel %vm1571_vm6, %v4434_v34, %v3681_v63  ;;  %v4439_v26 = vrot.slane %v3666_v57, 6  ;;  %v2080_v41 = vsel %vm1559_vm2, %v2079_v9, %v2078_v48  ;;  %2915 = vmatprep.mubr.msk.bf16.mxu0 %vm1699_vm9, %v1891_v23  ;;  %v4440_v47 = vrot.slane %v3728_v27, 4  ;;  %v4446_v9 = vld [vmem:[#allocation7_spill] sm:$0xff]  ;;  %v4447_v34 = vld [vmem:[#allocation10_spill] sm:$0xff]  ;;  %2922 = vmatpush3.bf16.msra.mxu0 %v3049_v32 }
 0x338   : > { %v2230_v55 = vsel %vm1574_vm7, %v4435_v60, %v2228_v25  ;;  %v2242_v51 = vsel %vm1571_vm6, %v4436_v46, %v3636_v4  ;;  %v2060_v4 = vrot.slane %v3809_v59, 4  ;;  %v4441_v61 = vrot.slane %v3809_v59, 5 }
 0x339   : > { %v4167_v63 = vsel %vm1577_vm8, %v4437_v7, %v2230_v55  ;;  %v2244_v13 = vsel %vm1574_vm7, %v4438_v36, %v2242_v51  ;;  %v2284_v5 = vsel %vm1571_vm6, %v4439_v26, %v3500_v19  ;;  %v2096_v8 = vrot.slane %v3971_v16, 7  ;;  %v3050_v19 = vld [vmem:[%s4384_s4 + $0x40] sm:$0xff]   ;;  %v3051_v51 = vld [vmem:[%s4384_s4 + $0x48] sm:$0xff]   ;;  %v4455_v26 = vld [vmem:[#allocation8_spill] sm:$0xff] }
 0x33a   : > { %v4183_v54 = vsel %vm1577_vm8, %v4440_v47, %v2244_v13  ;;  %v2286_v53 = vsel %vm1574_vm7, %v4441_v61, %v2284_v5  ;;  %v4442_v18 = vrot.slane %v3826_v56, 4  ;;  %v4443_v59 = vrot.slane %v3608_v15, 6  ;;  %2923 = vmatprep.subr.bf16.mxu0 %v3050_v19  ;;  %v4453_v36 = vld [vmem:[#allocation5_spill] sm:$0xff] }
 0x33b   : > { %v2331_v20 = vpack.c.b16 %v4183_v54, %v4167_v63  ;;  %v2082_v35 = vrot.slane %v3974_v52, 7  ;;  %v1874_v29 = vsel %vm1577_vm8, %v1873_v37, %v1872_v38  ;;  %v1888_v12 = vsel %vm1577_vm8, %v1887_v14, %v1886_v24  ;;  %v4449_v37 = vld [vmem:[#allocation13_spill] sm:$0xff]  ;;  %v4450_v38 = vld [vmem:[#allocation14_spill] sm:$0xff]  ;;  %2924 = vmatpush3.bf16.msra.mxu0 %v3050_v19 }
 0x33c   : > { %v4197_v27 = vsel %vm1577_vm8, %v4442_v18, %v2286_v53  ;;  %v2298_v58 = vsel %vm1571_vm6, %v4443_v59, %v3490_v44  ;;  %v4444_v30 = vrot.slane %v3767_v33, 5  ;;  %v4445_v40 = vrot.slane %v3822_v45, 5  ;;  %v4451_v24 = vld [vmem:[#allocation6_spill] sm:$0xff]  ;;  %2933 = vmatprep.subr.bf16.mxu0 %v3051_v51  ;;  %v4459_v54 = vld [vmem:[#allocation9_spill] sm:$0xff] }
 0x33d   : > { %v2046_v62 = vrot.slane %v4446_v9, 4  ;;  %v2032_v25 = vrot.slane %v4447_v34, 4  ;;  %v4448_v44 = vrot.slane %v3788_v39, 4  ;;  %v2095_v14 = vsel %vm1562_vm3, %v4449_v37, %v2094_v21 }
 0x33e   : > { %v2300_v11 = vsel %vm1574_vm7, %v4444_v30, %v2298_v58  ;;  %v2031_v48 = vsel %vm1571_vm6, %v4445_v40, %v2029_v3  ;;  %v2081_v60 = vsel %vm1562_vm3, %v4450_v38, %v2080_v41  ;;  %v2098_v55 = vrot.slane %v3994_v28, 6  ;;  %v4456_v41 = vld [vmem:[#allocation11_spill] sm:$0xff] }
 0x33f   : > { %v4217_v23 = vsel %vm1577_vm8, %v4448_v44, %v2300_v11  ;;  %v2084_v3 = vrot.slane %v4014_v49, 6  ;;  %v1892_v46 = vpack.c.b16 %v1888_v12, %v1874_v29  ;;  %v4452_v21 = vrot.slane %v3666_v57, 5  ;;  %v4457_v57 = vld [vmem:[#allocation15_spill] sm:$0xff] }
 0x340   : > { %v2333_v45 = vpack.c.b16 %v4217_v23, %v4197_v27  ;;  %v4454_v13 = vrot.slane %v3608_v15, 5  ;;  %v2048_v5 = vrot.slane %v4455_v26, 3  ;;  %v2034_v47 = vrot.slane %v4456_v41, 3 }
 0x341   : > { %v2059_v7 = vsel %vm1571_vm6, %v4452_v21, %v4451_v24  ;;  %v2097_v61 = vsel %vm1565_vm4, %v2096_v8, %v2095_v14  ;;  %v2083_v53 = vsel %vm1565_vm4, %v2082_v35, %v2081_v60  ;;  %v2076_v18 = vrot.slane %v3788_v39, 3  ;;  %2916 = vmatmul.mubr.msk.bf16.gmra.mrb[20].mxu0 %vm1699_vm9, %v1892_v46 }
 0x342   : > { %v2073_v32 = vsel %vm1571_vm6, %v4454_v13, %v4453_v36  ;;  %v2062_v59 = vrot.slane %v3826_v56, 3  ;;  %v2047_v58 = vsel %vm1574_vm7, %v2046_v62, %v4457_v57  ;;  %v2033_v29 = vsel %vm1574_vm7, %v2032_v25, %v2031_v48  ;;  %2925 = vmatprep.mubr.msk.bf16.mxu0 %vm1699_vm9, %v2106_v2  ;;  %v3052_v25 = vld [vmem:[%s4384_s4 + $0x50] sm:$0xff]   ;;  %v2697_v57 = vld [vmem:[%s4385_s5] ss:$0 sm:$0xff] }
 0x343   : > { %v2100_v15 = vrot.slane %v4011_v43, 5  ;;  %v2086_v12 = vrot.slane %v4016_v31, 5  ;;  %v2061_v8 = vsel %vm1574_vm7, %v2060_v4, %v2059_v7  ;;  %v4458_v39 = vrot.slane %v3767_v33, 4 }
 0x344   : > { %v2099_v35 = vsel %vm1568_vm5, %v2098_v55, %v2097_v61  ;;  %v2085_v30 = vsel %vm1568_vm5, %v2084_v3, %v2083_v53  ;;  %v2049_v11 = vsel %vm1577_vm8, %v2048_v5, %v2047_v58  ;;  %v2035_v40 = vsel %vm1577_vm8, %v2034_v47, %v2033_v29 }
 0x345   : > { %v2075_v56 = vsel %vm1574_vm7, %v4458_v39, %v2073_v32  ;;  %v2102_v48 = vrot.slane %v4031_v1, 4  ;;  %v2088_v2 = vrot.slane %v4033_v22, 4  ;;  %v2063_v19 = vsel %vm1577_vm8, %v2062_v59, %v2061_v8 }
 0x346   : > { %v2077_v4 = vsel %vm1577_vm8, %v2076_v18, %v2075_v56  ;;  %v2087_v33 = vsel %vm1571_vm6, %v2086_v12, %v2085_v30  ;;  %v2101_v9 = vsel %vm1571_vm6, %v2100_v15, %v2099_v35  ;;  %v2107_v62 = vpack.c.b16 %v2049_v11, %v2035_v40 }
 0x347   : > { %v2318_v34 = vrot.slane %v3965_v10, 2  ;;  %v2304_v44 = vrot.slane %v3968_v42, 2  ;;  %v2104_v14 = vrot.slane %v4048_v0, 3  ;;  %v2090_v60 = vrot.slane %v4051_v17, 3 }
 0x348   : > { %v2108_v55 = vpack.c.b16 %v2077_v4, %v2063_v19  ;;  %v2317_v3 = vrot.slane %v3949_v6, 3  ;;  %v2089_v46 = vsel %vm1574_vm7, %v2088_v2, %v2087_v33  ;;  %v2103_v24 = vsel %vm1574_vm7, %v2102_v48, %v2101_v9  ;;  %v3053_v6 = vld [vmem:[%s4384_s4 + $0x58] sm:$0xff]  }
 0x349   : > { %2926 = vmatmul.mubr.msk.bf16.vlgmr.msra.gmra.mrb[16].mxu0 %vm1699_vm9, %v2107_v62  ;;  %v2303_v10 = vrot.slane %v3951_v50, 3  ;;  %v2320_v21 = vrot.slane %v4449_v37, 1  ;;  %v2306_v7 = vrot.slane %v4450_v38, 1  ;;  %v2091_v13 = vsel %vm1577_vm8, %v2090_v60, %v2089_v46 }
 0x34a   : > { %2934 = vmatpush3.bf16.msra.mxu0 %v3051_v51  ;;  %2929 = vmatprep.mubr.msk.bf16.mxu0 %vm1699_vm9, %v2108_v55  ;;  %v2319_v42 = vsel %vm1559_vm2, %v2318_v34, %v2317_v3  ;;  %v2105_v50 = vsel %vm1577_vm8, %v2104_v14, %v2103_v24  ;;  %v2323_v32 = vrot.slane %v3994_v28, 7  ;;  %v2309_v38 = vrot.slane %v4014_v49, 7 }
 0x34b   : > { %2935 = vmatprep.subr.bf16.mxu0 %v3052_v25  ;;  %v2305_v36 = vsel %vm1559_vm2, %v2304_v44, %v2303_v10  ;;  %v2321_v37 = vsel %vm1562_vm3, %v2320_v21, %v2319_v42  ;;  %v2109_v26 = vpack.c.b16 %v2105_v50, %v2091_v13  ;;  %v2325_v47 = vrot.slane %v4011_v43, 6 }
 0x34c   : > { %v2307_v51 = vsel %vm1562_vm3, %v2306_v7, %v2305_v36  ;;  %v2322_v5 = vsel %vm1565_vm4, %v3971_v16, %v2321_v37  ;;  %v2311_v61 = vrot.slane %v4016_v31, 6  ;;  %v2327_v53 = vrot.slane %v4031_v1, 5 }
 0x34d   : > { %v2308_v41 = vsel %vm1565_vm4, %v3974_v52, %v2307_v51  ;;  %v2324_v28 = vsel %vm1568_vm5, %v2323_v32, %v2322_v5  ;;  %v2313_v16 = vrot.slane %v4033_v22, 5  ;;  %v2329_v31 = vrot.slane %v4048_v0, 4 }
 0x34e   : > { %2936 = vmatpush3.bf16.msra.mxu0 %v3052_v25  ;;  %v2310_v49 = vsel %vm1568_vm5, %v2309_v38, %v2308_v41  ;;  %v2326_v43 = vsel %vm1571_vm6, %v2325_v47, %v2324_v28  ;;  %v2315_v63 = vrot.slane %v4051_v17, 4 }
 0x34f   : > { %2937 = vmatprep.subr.bf16.mxu0 %v3053_v6  ;;  %v2312_v52 = vsel %vm1571_vm6, %v2311_v61, %v2310_v49  ;;  %v2328_v1 = vsel %vm1574_vm7, %v2327_v53, %v2326_v43 }
 0x350   : > { %v2314_v59 = vsel %vm1574_vm7, %v2313_v16, %v2312_v52  ;;  %v2330_v0 = vsel %vm1577_vm8, %v2329_v31, %v2328_v1 }
 0x351   : > { %2930 = vmatmul.mubr.msk.bf16.gmra.mrb[20].mxu0 %vm1699_vm9, %v2109_v26  ;;  %v2316_v22 = vsel %vm1577_vm8, %v2315_v63, %v2314_v59 }
 0x352   : > { %2939 = vmatprep.mubr.msk.bf16.mxu0 %vm1699_vm9, %v2331_v20  ;;  %2938 = vmatpush3.bf16.msra.mxu0 %v3053_v6  ;;  %v4460_v20 = vld [vmem:[#allocation12_spill] sm:$0xff]  ;;  %v2334_v17 = vpack.c.b16 %v2330_v0, %v2316_v22 }
 0x353   : > { %v4461_v18 = vpack.c.b16 %v4459_v54, %v4460_v20 }
 0x359   : > { %2940 = vmatmul.mubr.msk.bf16.vlgmr.msra.gmra.mrb[16].mxu0 %vm1699_vm9, %v4461_v18 }
 0x35a   : > { %2943 = vmatprep.mubr.msk.bf16.mxu0 %vm1699_vm9, %v2333_v45 }
 0x361   : > { %2944 = vmatmul.mubr.msk.bf16.gmra.mrb[20].mxu0 %vm1699_vm9, %v2334_v17 }
 0x42c   : > { %v2941_v58 = vpop.f32.mrb[16].mxu0 }
 0x42d   : > { %v2447_v29 = vadd.f32 %v2941_v58, %v2697_v57  ;;  %v2399_v15 = vpop.f32.mrb[17].mxu0 }
 0x42e   : > { %v2445_v12 = vadd.f32 %v2697_v57, %v2399_v15  ;;  %v2942_v27 = vpop.f32.mrb[18].mxu0 }
 0x42f   : > { %v2463_v23 = vmul.f32 0.2, %v2447_v29  ;;  %v2448_v45 = vadd.f32 %v2942_v27, %v2697_v57  ;;  %v2402_v8 = vpop.f32.mrb[19].mxu0  ;;  %vm2455_vm10 = vcmp.ge.f32.partialorder %v2447_v29, 0.0 }
 0x430   : > { %v2461_v39 = vmul.f32 0.2, %v2445_v12  ;;  %v2446_v56 = vadd.f32 %v2697_v57, %v2402_v8  ;;  %vm2453_vm11 = vcmp.ge.f32.partialorder %v2445_v12, 0.0 }
 0x431   : > { %vm2456_vm12 = vcmp.ge.f32.partialorder %v2448_v45, 0.0  ;;  %v2464_v35 = vmul.f32 0.2, %v2448_v45  ;;  %v2471_v11 = vsel %vm2455_vm10, %v2447_v29, %v2463_v23 }
 0x432   : > { %vm2454_vm13 = vcmp.ge.f32.partialorder %v2446_v56, 0.0  ;;  %v2462_v30 = vmul.f32 0.2, %v2446_v56  ;;  %v2469_v48 = vsel %vm2453_vm11, %v2445_v12, %v2461_v39 }
 0x433   : > { %v2472_v40 = vsel %vm2456_vm12, %v2448_v45, %v2464_v35 }
 0x434   : > { %v2728_v2 = vpack.c.bf16 %v2472_v40, %v2471_v11  ;;  %v2470_v19 = vsel %vm2454_vm13, %v2446_v56, %v2462_v30  ;;  %v2945_v4 = vpop.f32.mrb[20].mxu0 }
 0x435   : > { %v2723_v33 = vpack.c.bf16 %v2470_v19, %v2469_v48  ;;  %v2451_v9 = vadd.f32 %v2945_v4, %v2697_v57  ;;  %v2415_v62 = vpop.f32.mrb[21].mxu0 }
 0x436   : > { %2740 = vst [vmem:[%s244_s14 + $0x8] sm:$0xff] %v2728_v2   ;;  %v2449_v34 = vadd.f32 %v2697_v57, %v2415_v62  ;;  %v2946_v25 = vpop.f32.mrb[22].mxu0 }
 0x437   : > { %2724 = vst [vmem:[%s244_s14] sm:$0xff] %v2723_v33   ;;  %v2467_v44 = vmul.f32 0.2, %v2451_v9  ;;  %v2452_v14 = vadd.f32 %v2946_v25, %v2697_v57  ;;  %v2418_v60 = vpop.f32.mrb[23].mxu0  ;;  %vm2459_vm14 = vcmp.ge.f32.partialorder %v2451_v9, 0.0 }
 0x438   : > { %v2465_v55 = vmul.f32 0.2, %v2449_v34  ;;  %v2450_v3 = vadd.f32 %v2697_v57, %v2418_v60  ;;  %vm2457_vm15 = vcmp.ge.f32.partialorder %v2449_v34, 0.0 }
 0x439   : > { %vm2460_vm0 = vcmp.ge.f32.partialorder %v2452_v14, 0.0  ;;  %v2468_v46 = vmul.f32 0.2, %v2452_v14  ;;  %v2475_v10 = vsel %vm2459_vm14, %v2451_v9, %v2467_v44 }
 0x43a   : > { %vm2458_vm1 = vcmp.ge.f32.partialorder %v2450_v3, 0.0  ;;  %v2466_v24 = vmul.f32 0.2, %v2450_v3  ;;  %v2473_v42 = vsel %vm2457_vm15, %v2449_v34, %v2465_v55 }
 0x43b   : > { %v2476_v21 = vsel %vm2460_vm0, %v2452_v14, %v2468_v46 }
 0x43c   : > { %v2738_v7 = vpack.c.bf16 %v2476_v21, %v2475_v10  ;;  %v2474_v6 = vsel %vm2458_vm1, %v2450_v3, %v2466_v24 }
 0x43d   : > { %v2733_v36 = vpack.c.bf16 %v2474_v6, %v2473_v42 }
 0x43e   : > { %2742 = vst [vmem:[%s244_s14 + $0x18] sm:$0xff] %v2738_v7  }
 0x43f   : > { %2741 = vst [vmem:[%s244_s14 + $0x10] sm:$0xff] %v2733_v36  }
 0x440   : > { %3067 = shalt.err (!%p3064_p3)
}
 0x441   : > { %s3068_s9 = scalar_lea.hbm %s4333_s19, 512  ;;  %s3072_s12 = scalar_lea.hbm %s4386_s6, 1024 }
 0x442   : > { %p3069_p4 = scmp.ne.s32.totalorder %s4333_s19, %s3068_s9  ;;  %p3073_p9 = scmp.lt.u32.totalorder %s4333_s19, %s4386_s6 }
 0x443   : > { %p3074_p10 = scmp.lt.u32.totalorder %s3072_s12, %s3068_s9  ;;  %p3076_p12 = scmp.lt.u32.totalorder %s3068_s9, %s4333_s19 }
 0x444   : > { %p3070_p7 = pnand %p3069_p4, %p3194_p5 }
 0x445   : > { %p3075_p11 = por %p3074_p10, %p3073_p9 }
 0x446   : > { %p3071_p8 = pneg %p3070_p7 }
 0x447   : > { %p3077_p13 = por %p3076_p12, %p3075_p11 }
 0x449   : > { %p3078_p0 = pnand %p3077_p13, %p3071_p8 }
 0x44b   : > { %3081 = shalt.err (!%p3078_p0)
}
 0x44c   : > { %s3119_s15 = smov 64   ;;  %s3120_s17 = smov 4  }
 0x44d   : > { %2984 = dma.vmem_to_hbm [thread:$0]  (%p3194_p5), %s4335_s16, 512, %s4333_s19, %s4339_s25, %s3119_s15, %s3119_s15, %s3120_s17  }
 0x44e PF: > { %p2990_p1 = scmp.ge.s32.totalorder %s3116_s24, 2  ;;  %s2546_s18 = sand.u32 1, %s3104_s21  }
 0x44f   : > { %s2547_s20 = scalar_lea.sflag [#allocation3], %s2546_s18 }
 0x450   : > { %p2987_p2 = pnand %p2990_p1, %p3198_p6 }
 0x452   : > { %3099 = dma.done.wait (!%p2987_p2), %s2547_s20, 512  }
 0x453   : > { %3101 = vsyncadd (!%p2987_p2), %s2547_s20, 4294966784  ;;  %p16_p3 = scmp.ge.s32.totalorder %s3181_s27, 4   ;;  %s4462_s21 = smov %s3108_s22 }
 0x454   : > { %s4463_s22 = smov %s3112_s23  ;;  %s4464_s23 = smov %s3192_s30 }
 0x455   : > { %s4465_s24 = smov %s3181_s27  ;;  %18 = sbr.rel (!%p16_p3) target bundleno = 3 (0x3), region = 79 }
 0x45c   :  { %2552 = vsyncpa [#allocation3], 1 }
 0x45d   :  { %2554 = vsyncpa [#allocation3 + $0x1], 1 }

</bundles_post_ra>
